<compile_context>
chip_gen: v7x
topology: tpu7x:2x2x1
jax: 0.10.0
libtpu: 0.0.40
codegen_flags: <defaults>
</compile_context>

<pallas_src>
import functools

import jax
import jax.numpy as jnp
from jax import lax
from jax.experimental import pallas as pl
from jax.experimental.pallas import tpu as pltpu


def _round_up(x, m):
    return (x + m - 1) // m * m


def _vmem_capacity_bytes():
    """Physical per-core VMEM (128 MiB v5e/v6e, 64 MiB v7x); conservative fallback."""
    try:
        cap = getattr(pltpu.get_tpu_info(), "vmem_capacity_bytes", None)
        if cap:
            return int(cap)
    except Exception:
        pass
    return 64 << 20


def _l2_normalize(h):
    # rsqrt-based L2 normalization (EUP slot); matches F.normalize(eps=1e-12) in f32.
    return h * lax.rsqrt(jnp.maximum(jnp.sum(h * h, axis=-1, keepdims=True), 1e-24))


# ---------------------------------------------------------------------------
# Fused kernel: whole multi-layer forward with the graph resident in VMEM.
# ---------------------------------------------------------------------------
def _agnn_fused_kernel(betas_ref, feat_ref, adj_ref, w_ref, out_ref, *,
                       num_layers, mxu_dtype, approx_recip):
    h = feat_ref[...].astype(jnp.float32)
    for layer in range(num_layers):
        beta = betas_ref[layer]
        hn = _l2_normalize(h).astype(mxu_dtype)               # normalize once per layer
        # S[i, j] = <hn_i, hn_j>  (MXU, f32 accumulate).
        s = lax.dot_general(hn, hn, (((1,), (1,)), ((), ())),
                            preferred_element_type=jnp.float32)
        # exp(beta*s - |beta|) <= ~1 for any beta since |s| <= ~1; shift cancels below.
        # adj stays int8 in VMEM; promote on the fly (non-edges -> exact 0).
        p = jnp.exp(beta * s - jnp.abs(beta)) * adj_ref[...].astype(jnp.float32)
        denom = jnp.sum(p, axis=-1, keepdims=True)
        agg = jnp.dot(p.astype(mxu_dtype), h.astype(mxu_dtype),
                      preferred_element_type=jnp.float32)
        # Zero-in-degree rows: numerator is exactly 0 -> output row 0 (matches DGL).
        h = agg * pl.reciprocal(jnp.maximum(denom, 1e-30), approx=approx_recip)
    out_ref[...] = jnp.dot(h.astype(mxu_dtype), w_ref[...],
                           preferred_element_type=jnp.float32)


# ---------------------------------------------------------------------------
# Tiled per-layer kernels: grid over destination-row tiles (scales past VMEM,
# "parallel" axis lets v7x use both TensorCores).
# ---------------------------------------------------------------------------
def _prep_kernel(feat_ref, h_ref, hn_ref):
    # One pass: cast h to storage/MXU dtype and precompute hn = L2-normalize(h).
    h = feat_ref[...].astype(jnp.float32)
    h_ref[...] = h.astype(h_ref.dtype)
    hn_ref[...] = _l2_normalize(h).astype(hn_ref.dtype)


def _agnn_layer_tile(beta, h_all_ref, hn_all_ref, adj_ref, *,
                     tm, mxu_dtype, approx_recip):
    # Destination rows sliced from the resident (already normalized) block: no extra DMA.
    row0 = pl.multiple_of(pl.program_id(0) * tm, tm)
    hn_dst = hn_all_ref[pl.ds(row0, tm), :]
    s = lax.dot_general(hn_dst, hn_all_ref[...], (((1,), (1,)), ((), ())),
                        preferred_element_type=jnp.float32)
    p = jnp.exp(beta * s - jnp.abs(beta)) * adj_ref[...].astype(jnp.float32)
    denom = jnp.sum(p, axis=-1, keepdims=True)
    agg = jnp.dot(p.astype(mxu_dtype), h_all_ref[...],
                  preferred_element_type=jnp.float32)
    return agg * pl.reciprocal(jnp.maximum(denom, 1e-30), approx=approx_recip)


def _agnn_layer_kernel(beta_ref, h_all_ref, hn_all_ref, adj_ref,
                       h_out_ref, hn_out_ref, *, tm, mxu_dtype, approx_recip):
    h_new = _agnn_layer_tile(beta_ref[0], h_all_ref, hn_all_ref, adj_ref,
                             tm=tm, mxu_dtype=mxu_dtype, approx_recip=approx_recip)
    h_out_ref[...] = h_new.astype(h_out_ref.dtype)
    # Emit the normalized features for the next layer here (row-local, one pass).
    hn_out_ref[...] = _l2_normalize(h_new).astype(hn_out_ref.dtype)


def _agnn_layer_proj_kernel(beta_ref, h_all_ref, hn_all_ref, adj_ref, w_ref, out_ref,
                            *, tm, mxu_dtype, approx_recip):
    h_new = _agnn_layer_tile(beta_ref[0], h_all_ref, hn_all_ref, adj_ref,
                             tm=tm, mxu_dtype=mxu_dtype, approx_recip=approx_recip)
    out_ref[...] = jnp.dot(h_new.astype(mxu_dtype), w_ref[...],
                           preferred_element_type=jnp.float32)


def _linear_kernel(h_ref, w_ref, out_ref, *, mxu_dtype):
    out_ref[...] = jnp.dot(h_ref[...].astype(mxu_dtype), w_ref[...],
                           preferred_element_type=jnp.float32)


# ---------------------------------------------------------------------------
# Wrapper
# ---------------------------------------------------------------------------
def dgl_agnn_net_forward(features, adj, betas, weight, *,
                         precise=False, row_tile=256, fuse_vmem_budget=None):
    """features: [N, F], adj: [N, N] (adj[i, j] != 0 iff edge j->i), betas: [L],
    weight: [C, F] (PyTorch nn.Linear layout).

    precise=False (default): bf16 MXU operands/storage + approx EUP reciprocal.
        The MXU is bf16-native on v5e, v6e and v7x so this is the fast path on every
        generation; all element-wise softmax math stays f32.
    precise=True: f32 MXU operands/storage + exact reciprocal (faithful to torch f32).
    """
    n, f = features.shape
    c = weight.shape[0]
    num_layers = int(betas.shape[0])

    mxu_dtype = jnp.float32 if precise else jnp.bfloat16
    approx_recip = not precise
    msize = jnp.dtype(mxu_dtype).itemsize

    # Lane-dense padding (exact: zero rows/columns contribute nothing).
    fp = _round_up(f, 128)
    cp = _round_up(c, 128)

    # Generation-aware VMEM budgets.
    vmem_cap = _vmem_capacity_bytes()
    vmem_hard_cap = int(vmem_cap * 0.80)            # headroom below physical VMEM
    if fuse_vmem_budget is None:
        fuse_vmem_budget = int(vmem_cap * 0.40)

    n128 = _round_up(max(n, 1), 128)
    # Rough VMEM footprint of the fully fused problem (adj int8 + s/p f32 + f32 h's).
    fused_bytes = (n128 * n128 * (1 + 8) + 4 * n128 * fp * 4
                   + fp * cp * msize + n128 * cp * 4)
    use_fused = fused_bytes <= fuse_vmem_budget

    if use_fused:
        npad = n128
        tm = npad
    else:
        # tm a multiple of 128 (>= 128) keeps the MXU full and amortizes grid overhead.
        tm = max(128, (min(row_tile, n128) // 128) * 128)
        npad = _round_up(n, tm)

    betas_f32 = betas.astype(jnp.float32).reshape(-1)

    feat_p = jnp.zeros((npad, fp), jnp.float32).at[:n, :f].set(
        features.astype(jnp.float32))
    adj_p = jnp.zeros((npad, npad), jnp.int8).at[:n, :n].set(
        (adj != 0).astype(jnp.int8))
    w_t_p = jnp.zeros((fp, cp), mxu_dtype).at[:f, :c].set(
        weight.T.astype(mxu_dtype))

    if use_fused:
        vmem_limit = int(min(max(2 * fused_bytes, 32 << 20), vmem_hard_cap))
        betas_arg = betas_f32 if num_layers > 0 else jnp.zeros((1,), jnp.float32)
        kernel = functools.partial(_agnn_fused_kernel, num_layers=num_layers,
                                   mxu_dtype=mxu_dtype, approx_recip=approx_recip)
        out_p = pl.pallas_call(
            kernel,
            out_shape=jax.ShapeDtypeStruct((npad, cp), jnp.float32),
            in_specs=[
                pl.BlockSpec(memory_space=pltpu.MemorySpace.SMEM),   # betas
                pl.BlockSpec(memory_space=pltpu.MemorySpace.VMEM),   # features (f32)
                pl.BlockSpec(memory_space=pltpu.MemorySpace.VMEM),   # adjacency (int8)
                pl.BlockSpec(memory_space=pltpu.MemorySpace.VMEM),   # W^T (mxu dtype)
            ],
            out_specs=pl.BlockSpec(memory_space=pltpu.MemorySpace.VMEM),
            compiler_params=pltpu.CompilerParams(vmem_limit_bytes=vmem_limit),
        )(betas_arg, feat_p, adj_p, w_t_p)
        return out_p[:n, :c]

    # ---------------- tiled path: grid over destination-row tiles ----------------
    grid = (npad // tm,)
    vmem_need = (2 * 2 * npad * fp * msize           # resident h_all + hn_all
                 + 2 * tm * npad                     # adj int8 double buffer
                 + 3 * tm * npad * 4                 # s / p f32 intermediates
                 + 2 * 2 * tm * fp * msize           # (h, hn) output double buffers
                 + 2 * tm * cp * 4                   # projection output double buffer
                 + 2 * fp * cp * msize)              # resident W^T
    vmem_limit = int(min(max(int(1.5 * vmem_need), 32 << 20), vmem_hard_cap))
    cparams = pltpu.CompilerParams(dimension_semantics=("parallel",),
                                   vmem_limit_bytes=vmem_limit)

    beta_spec = pl.BlockSpec(memory_space=pltpu.MemorySpace.SMEM)
    # Constant block index -> not re-DMA'd across grid steps.
    h_all_spec = pl.BlockSpec((npad, fp), lambda i: (0, 0))
    hn_all_spec = pl.BlockSpec((npad, fp), lambda i: (0, 0))
    w_spec = pl.BlockSpec((fp, cp), lambda i: (0, 0))
    adj_spec = pl.BlockSpec((tm, npad), lambda i: (i, 0))
    feat_tile_spec = pl.BlockSpec((tm, fp), lambda i: (i, 0))
    h_tile_out = pl.BlockSpec((tm, fp), lambda i: (i, 0))
    out_tile_spec = pl.BlockSpec((tm, cp), lambda i: (i, 0))

    if num_layers == 0:
        out_p = pl.pallas_call(
            functools.partial(_linear_kernel, mxu_dtype=mxu_dtype),
            grid=grid,
            out_shape=jax.ShapeDtypeStruct((npad, cp), jnp.float32),
            in_specs=[feat_tile_spec, w_spec],
            out_specs=out_tile_spec,
            compiler_params=cparams,
        )(feat_p, w_t_p)
        return out_p[:n, :c]

    # One-pass prep: cast h and precompute hn once (instead of per grid step per layer).
    h, hn = pl.pallas_call(
        _prep_kernel,
        grid=grid,
        out_shape=(jax.ShapeDtypeStruct((npad, fp), mxu_dtype),
                   jax.ShapeDtypeStruct((npad, fp), mxu_dtype)),
        in_specs=[feat_tile_spec],
        out_specs=[h_tile_out, h_tile_out],
        compiler_params=cparams,
    )(feat_p)

    layer_kernel = functools.partial(_agnn_layer_kernel, tm=tm, mxu_dtype=mxu_dtype,
                                     approx_recip=approx_recip)
    proj_kernel = functools.partial(_agnn_layer_proj_kernel, tm=tm, mxu_dtype=mxu_dtype,
                                    approx_recip=approx_recip)

    for layer in range(num_layers - 1):
        h, hn = pl.pallas_call(
            layer_kernel,
            grid=grid,
            out_shape=(jax.ShapeDtypeStruct((npad, fp), mxu_dtype),
                       jax.ShapeDtypeStruct((npad, fp), mxu_dtype)),
            in_specs=[beta_spec, h_all_spec, hn_all_spec, adj_spec],
            out_specs=[h_tile_out, h_tile_out],
            compiler_params=cparams,
        )(betas_f32[layer].reshape(1), h, hn, adj_p)

    out_p = pl.pallas_call(
        proj_kernel,
        grid=grid,
        out_shape=jax.ShapeDtypeStruct((npad, cp), jnp.float32),
        in_specs=[beta_spec, h_all_spec, hn_all_spec, adj_spec, w_spec],
        out_specs=out_tile_spec,
        compiler_params=cparams,
    )(betas_f32[num_layers - 1].reshape(1), h, hn, adj_p, w_t_p)
    return out_p[:n, :c]


def _reference_forward(features, adj, betas, weight):
    """Pure-JAX reference mirroring DGL AGNNConv + nn.Linear(bias=False)."""
    h = features.astype(jnp.float32)
    mask = adj > 0.0
    adj_f = mask.astype(jnp.float32)
    for layer in range(betas.shape[0]):
        hn = h / jnp.maximum(jnp.linalg.norm(h, axis=-1, keepdims=True), 1e-12)
        e = jnp.where(mask, betas[layer] * (hn @ hn.T), -1e30)
        m = jnp.max(e, axis=-1, keepdims=True)
        p = jnp.exp(e - m) * adj_f
        alpha = p / jnp.maximum(jnp.sum(p, axis=-1, keepdims=True), 1e-30)
        h = alpha @ h
    return h @ weight.T


if __name__ == "__main__":
    # Small, module-consistent shapes: N nodes, num_feats, num_classes, num_layers.
    N, NUM_FEATS, NUM_CLASSES, NUM_LAYERS = 32, 16, 8, 2

    key = jax.random.PRNGKey(0)
    k_feat, k_adj, k_w = jax.random.split(key, 3)

    features = jax.random.normal(k_feat, (N, NUM_FEATS), dtype=jnp.float32)
    adj = (jax.random.uniform(k_adj, (N, N)) < 0.3).astype(jnp.float32)  # ~30% density

    betas = jnp.ones((NUM_LAYERS,), dtype=jnp.float32)          # AGNNConv init_beta = 1.0
    weight = jax.random.normal(k_w, (NUM_CLASSES, NUM_FEATS), dtype=jnp.float32)
    weight = weight * (1.0 / jnp.sqrt(jnp.float32(NUM_FEATS)))  # ~ nn.Linear default scale

    ref = _reference_forward(features, adj, betas, weight)

    # 1) Precise, fused (small graph fits the VMEM budget) — tight tolerance.
    out = jax.block_until_ready(
        dgl_agnn_net_forward(features, adj, betas, weight, precise=True))
    assert out.shape == (N, NUM_CLASSES)
    assert jnp.allclose(out, ref, atol=1e-3, rtol=1e-3), "fused precise path mismatch"

    # 2) Precise, forced row-tiled path (exercises the grid / parallel semantics).
    out_tiled = jax.block_until_ready(
        dgl_agnn_net_forward(features, adj, betas, weight, precise=True,
                             fuse_vmem_budget=0))
    assert jnp.allclose(out_tiled, ref, atol=1e-3, rtol=1e-3), "tiled precise mismatch"

    # 3) Default fast path (bf16 MXU operands + approx reciprocal) — loose tolerance.
    out_fast = jax.block_until_ready(dgl_agnn_net_forward(features, adj, betas, weight))
    assert jnp.all(jnp.isfinite(out_fast))
    assert jnp.allclose(out_fast, ref, atol=1e-1, rtol=1e-1), "bf16 fast path mismatch"

    # 4) Fast path, forced tiled (bf16 storage between layers, int8 adjacency stream).
    out_fast_tiled = jax.block_until_ready(
        dgl_agnn_net_forward(features, adj, betas, weight, fuse_vmem_budget=0))
    assert jnp.allclose(out_fast_tiled, ref, atol=1e-1, rtol=1e-1), "bf16 tiled mismatch"

    print("KERNEL_OK")
</pallas_src>

<mosaic_0001>
module attributes {stable_mosaic.version = 11 : i64} {
  func.func @_agnn_fused_kernel(%arg0: memref<2xf32, #tpu.memory_space<smem>>, %arg1: memref<128x128xf32, #tpu.memory_space<vmem>>, %arg2: memref<128x128xi8, #tpu.memory_space<vmem>>, %arg3: memref<128x128xf32, #tpu.memory_space<vmem>>, %arg4: memref<128x128xf32, #tpu.memory_space<vmem>>) attributes {dimension_semantics = [], scalar_prefetch = 0 : i64, scratch_operands = 0 : i64, tpu.core_type = #tpu.core_type<tc>} {
    %c0 = arith.constant 0 : index
    %c0_0 = arith.constant 0 : index
    %0 = vector.load %arg1[%c0, %c0_0] : memref<128x128xf32, #tpu.memory_space<vmem>>, vector<128x128xf32>
    %c0_1 = arith.constant 0 : index
    %1 = memref.load %arg0[%c0_1] : memref<2xf32, #tpu.memory_space<smem>>
    %2 = arith.mulf %0, %0 : vector<128x128xf32>
    %cst = arith.constant dense<0.000000e+00> : vector<128xf32>
    %3 = vector.multi_reduction <add>, %2, %cst [1] : vector<128x128xf32> to vector<128xf32>
    %4 = vector.shape_cast %3 : vector<128xf32> to vector<128x1xf32>
    %cst_2 = arith.constant 1.000000e-24 : f32
    %5 = vector.broadcast %cst_2 : f32 to vector<128x1xf32>
    %6 = arith.maximumf %4, %5 : vector<128x1xf32>
    %7 = math.rsqrt %6 : vector<128x1xf32>
    %8 = vector.broadcast %7 : vector<128x1xf32> to vector<128x128xf32>
    %9 = arith.mulf %0, %8 : vector<128x128xf32>
    %cst_3 = arith.constant dense<0.000000e+00> : vector<128x128xf32>
    %10 = tpu.matmul %9, %9, %cst_3 {dimension_numbers = #tpu.dot_dimension_numbers<[1], [1], [0], [0], [0, 0, 1, 0], [], []>} : vector<128x128xf32>, vector<128x128xf32>, vector<128x128xf32> -> vector<128x128xf32>
    %11 = vector.broadcast %1 : f32 to vector<128x128xf32>
    %12 = arith.mulf %11, %10 : vector<128x128xf32>
    %13 = math.absf %1 : f32
    %14 = vector.broadcast %13 : f32 to vector<128x128xf32>
    %15 = arith.subf %12, %14 : vector<128x128xf32>
    %16 = math.exp %15 : vector<128x128xf32>
    %c0_4 = arith.constant 0 : index
    %c0_5 = arith.constant 0 : index
    %17 = vector.load %arg2[%c0_4, %c0_5] : memref<128x128xi8, #tpu.memory_space<vmem>>, vector<128x128xi8>
    %18 = arith.sitofp %17 : vector<128x128xi8> to vector<128x128xf32>
    %19 = arith.mulf %16, %18 : vector<128x128xf32>
    %cst_6 = arith.constant dense<0.000000e+00> : vector<128xf32>
    %20 = vector.multi_reduction <add>, %19, %cst_6 [1] : vector<128x128xf32> to vector<128xf32>
    %21 = vector.shape_cast %20 : vector<128xf32> to vector<128x1xf32>
    %cst_7 = arith.constant dense<0.000000e+00> : vector<128x128xf32>
    %22 = tpu.matmul %19, %0, %cst_7 {dimension_numbers = #tpu.dot_dimension_numbers<[1], [0], [0], [1], [0, 0, 1, 1], [], []>} : vector<128x128xf32>, vector<128x128xf32>, vector<128x128xf32> -> vector<128x128xf32>
    %cst_8 = arith.constant 1.000000e-30 : f32
    %23 = vector.broadcast %cst_8 : f32 to vector<128x1xf32>
    %24 = arith.maximumf %21, %23 : vector<128x1xf32>
    %25 = tpu.reciprocal %24 : vector<128x1xf32> -> vector<128x1xf32>
    %26 = vector.broadcast %25 : vector<128x1xf32> to vector<128x128xf32>
    %27 = arith.mulf %22, %26 : vector<128x128xf32>
    %c1 = arith.constant 1 : index
    %28 = memref.load %arg0[%c1] : memref<2xf32, #tpu.memory_space<smem>>
    %29 = arith.mulf %27, %27 : vector<128x128xf32>
    %cst_9 = arith.constant dense<0.000000e+00> : vector<128xf32>
    %30 = vector.multi_reduction <add>, %29, %cst_9 [1] : vector<128x128xf32> to vector<128xf32>
    %31 = vector.shape_cast %30 : vector<128xf32> to vector<128x1xf32>
    %cst_10 = arith.constant 1.000000e-24 : f32
    %32 = vector.broadcast %cst_10 : f32 to vector<128x1xf32>
    %33 = arith.maximumf %31, %32 : vector<128x1xf32>
    %34 = math.rsqrt %33 : vector<128x1xf32>
    %35 = vector.broadcast %34 : vector<128x1xf32> to vector<128x128xf32>
    %36 = arith.mulf %27, %35 : vector<128x128xf32>
    %cst_11 = arith.constant dense<0.000000e+00> : vector<128x128xf32>
    %37 = tpu.matmul %36, %36, %cst_11 {dimension_numbers = #tpu.dot_dimension_numbers<[1], [1], [0], [0], [0, 0, 1, 0], [], []>} : vector<128x128xf32>, vector<128x128xf32>, vector<128x128xf32> -> vector<128x128xf32>
    %38 = vector.broadcast %28 : f32 to vector<128x128xf32>
    %39 = arith.mulf %38, %37 : vector<128x128xf32>
    %40 = math.absf %28 : f32
    %41 = vector.broadcast %40 : f32 to vector<128x128xf32>
    %42 = arith.subf %39, %41 : vector<128x128xf32>
    %43 = math.exp %42 : vector<128x128xf32>
    %c0_12 = arith.constant 0 : index
    %c0_13 = arith.constant 0 : index
    %44 = vector.load %arg2[%c0_12, %c0_13] : memref<128x128xi8, #tpu.memory_space<vmem>>, vector<128x128xi8>
    %45 = arith.sitofp %44 : vector<128x128xi8> to vector<128x128xf32>
    %46 = arith.mulf %43, %45 : vector<128x128xf32>
    %cst_14 = arith.constant dense<0.000000e+00> : vector<128xf32>
    %47 = vector.multi_reduction <add>, %46, %cst_14 [1] : vector<128x128xf32> to vector<128xf32>
    %48 = vector.shape_cast %47 : vector<128xf32> to vector<128x1xf32>
    %cst_15 = arith.constant dense<0.000000e+00> : vector<128x128xf32>
    %49 = tpu.matmul %46, %27, %cst_15 {dimension_numbers = #tpu.dot_dimension_numbers<[1], [0], [0], [1], [0, 0, 1, 1], [], []>} : vector<128x128xf32>, vector<128x128xf32>, vector<128x128xf32> -> vector<128x128xf32>
    %cst_16 = arith.constant 1.000000e-30 : f32
    %50 = vector.broadcast %cst_16 : f32 to vector<128x1xf32>
    %51 = arith.maximumf %48, %50 : vector<128x1xf32>
    %52 = tpu.reciprocal %51 : vector<128x1xf32> -> vector<128x1xf32>
    %53 = vector.broadcast %52 : vector<128x1xf32> to vector<128x128xf32>
    %54 = arith.mulf %49, %53 : vector<128x128xf32>
    %c0_17 = arith.constant 0 : index
    %c0_18 = arith.constant 0 : index
    %55 = vector.load %arg3[%c0_17, %c0_18] : memref<128x128xf32, #tpu.memory_space<vmem>>, vector<128x128xf32>
    %cst_19 = arith.constant dense<0.000000e+00> : vector<128x128xf32>
    %56 = tpu.matmul %54, %55, %cst_19 {dimension_numbers = #tpu.dot_dimension_numbers<[1], [0], [0], [1], [0, 0, 1, 1], [], []>} : vector<128x128xf32>, vector<128x128xf32>, vector<128x128xf32> -> vector<128x128xf32>
    %c0_20 = arith.constant 0 : index
    %c0_21 = arith.constant 0 : index
    %57 = vector.load %arg4[%c0_20, %c0_21] : memref<128x128xf32, #tpu.memory_space<vmem>>, vector<128x128xf32>
    tpu.vector_store %arg4[%c0_20, %c0_21], %56 {strides = array<i32>} : memref<128x128xf32, #tpu.memory_space<vmem>>, vector<128x128xf32>,
    return
  }
}

</mosaic_0001>

<bundles_post_ra>
// kernel: tpu_custom_call.1
= control target key start
LH: loop header
LB: loop body
LE: loop exit
PB: predicated region body
PF: predicated region fallthrough
CT: control target
= control target key end

     0   :  { %9 = vsyncpa [#allocation5], 0  ;;  %s2824_s0 = inlined_call_operand.hbm [shape: f32[2], index: 0, kind: input, shape index: {}]   ;;  %s2825_s1 = inlined_call_operand.hbm [shape: f32[128,128], index: 1, kind: input, shape index: {}]   ;;  %s2826_s2 = inlined_call_operand.hbm [shape: s8[128,128], index: 2, kind: input, shape index: {}]   ;;  %s2827_s3 = inlined_call_operand.hbm [shape: f32[128,128], index: 3, kind: input, shape index: {}]   ;;  %s2828_s4 = inlined_call_operand.hbm [shape: f32[128,128], index: 4, kind: output, shape index: {}]  }
   0x1   :  { %10 = vsyncpa [#allocation3], 0 }
   0x2   :  { %11 = vsyncpa [#allocation8], 0 }
   0x3   :  { %12 = vsyncpa [#allocation4], 0  ;;  %s2340_s15 = smov [#allocation7]   ;;  %s2341_s17 = smov [#allocation6]  }
   0x4   :  { %s38_s16 = sshll.u32 %s2340_s15, 4  ;;  %s26_s18 = sshll.u32 %s2341_s17, 4  ;;  %s39_s16 = int_to_ptr.vmem [resolvable:$true] %s38_s16  ;;  %s27_s18 = int_to_ptr.vmem [resolvable:$true] %s26_s18 }
   0x5   :  { %s2234_s21 = scalar_lea.hbm %s2826_s2, 512 }
   0x6   :  { %p2235_p0 = scmp.ne.s32.totalorder %s2826_s2, %s2234_s21  ;;  %p2238_p1 = scmp.lt.u32.totalorder %s2234_s21, %s2826_s2 }
   0x8   :  { %p2240_p2 = pnand %p2238_p1, %p2235_p0 }
   0xa   :  { %2243 = shalt.err (!%p2240_p2)
}
   0xb   :  { %s2244_s26 = scalar_lea.vmem %s39_s16, 512  ;;  %p2249_p4 = scmp.lt.s32.totalorder %s39_s16, %s39_s16 }
   0xc   :  { %p2245_p3 = scmp.ne.s32.totalorder %s39_s16, %s2244_s26  ;;  %p2250_p5 = scmp.lt.s32.totalorder %s2244_s26, %s2244_s26 }
   0xe   :  { %p2251_p6 = por %p2250_p5, %p2249_p4 }
  0x10   :  { %p2252_p7 = pnand %p2251_p6, %p2245_p3 }
  0x12   :  { %2255 = shalt.err (!%p2252_p7)
}
  0x13   :  { %s2342_s27 = smov 128   ;;  %s2343_s28 = smov 8  }
  0x14   :  { %44 = dma.hbm_to_vmem [thread:$0]  %s2826_s2, 512, %s39_s16, [#allocation8], %s2342_s27, %s2342_s27, %s2343_s28  }
  0x15   :  { %s2256_s7 = scalar_lea.hbm %s2824_s0, 16 }
  0x16   :  { %p2257_p8 = scmp.ne.s32.totalorder %s2824_s0, %s2256_s7  ;;  %p2260_p9 = scmp.lt.u32.totalorder %s2256_s7, %s2824_s0 }
  0x18   :  { %p2262_p10 = pnand %p2260_p9, %p2257_p8 }
  0x1a   :  { %2265 = shalt.err (!%p2262_p10)
}
  0x1b   :  { %s2344_s12 = smov [#allocation2]   ;;  %s2266_s16 = scalar_lea.hbm %s2825_s1, 2048 }
  0x1c   :  { %20 = dma.hbm_to_smem %s2824_s0, 16, %s2344_s12, [#allocation5]  }
  0x1d   :  { %p2267_p11 = scmp.ne.s32.totalorder %s2825_s1, %s2266_s16  ;;  %p2270_p12 = scmp.lt.u32.totalorder %s2266_s16, %s2825_s1 }
  0x1f   :  { %p2272_p13 = pnand %p2270_p12, %p2267_p11 }
  0x21   :  { %2275 = shalt.err (!%p2272_p13)
}
  0x22   :  { %s2276_s22 = scalar_lea.vmem %s27_s18, 2048  ;;  %p2281_p1 = scmp.lt.s32.totalorder %s27_s18, %s27_s18 }
  0x23   :  { %p2277_p0 = scmp.ne.s32.totalorder %s27_s18, %s2276_s22  ;;  %p2282_p2 = scmp.lt.s32.totalorder %s2276_s22, %s2276_s22 }
  0x25   :  { %p2283_p3 = por %p2282_p2, %p2281_p1 }
  0x27   :  { %p2284_p4 = pnand %p2283_p3, %p2277_p0 }
  0x29   :  { %2287 = shalt.err (!%p2284_p4)
}
  0x2a   :  { %32 = dma.hbm_to_vmem [thread:$0]  %s2825_s1, 2048, %s27_s18, [#allocation3], %s2342_s27, %s2342_s27, %s2343_s28  }
  0x2b   :  { %s2345_s24 = smov [#allocation9]   ;;  %s2288_s30 = scalar_lea.hbm %s2827_s3, 2048 }
  0x2c   :  { %s50_s25 = sshll.u32 %s2345_s24, 4  ;;  %p2289_p5 = scmp.ne.s32.totalorder %s2827_s3, %s2288_s30  ;;  %s51_s25 = int_to_ptr.vmem [resolvable:$true] %s50_s25 }
  0x2d   :  { %p2292_p6 = scmp.lt.u32.totalorder %s2288_s30, %s2827_s3 }
  0x2f   :  { %p2294_p7 = pnand %p2292_p6, %p2289_p5 }
  0x31   :  { %2297 = shalt.err (!%p2294_p7)
}
  0x32   :  { %s2298_s9 = scalar_lea.vmem %s51_s25, 2048  ;;  %p2303_p9 = scmp.lt.s32.totalorder %s51_s25, %s51_s25 }
  0x33   :  { %p2299_p8 = scmp.ne.s32.totalorder %s51_s25, %s2298_s9  ;;  %p2304_p10 = scmp.lt.s32.totalorder %s2298_s9, %s2298_s9 }
  0x35   :  { %p2305_p11 = por %p2304_p10, %p2303_p9 }
  0x37   :  { %p2306_p12 = pnand %p2305_p11, %p2299_p8 }
  0x39   :  { %2309 = shalt.err (!%p2306_p12)
}
  0x3a   :  { %56 = dma.hbm_to_vmem [thread:$0]  %s2827_s3, 2048, %s51_s25, [#allocation8], %s2342_s27, %s2342_s27, %s2343_s28  }
  0x3b   :  { %2332 = dma.done.wait [#allocation5], 16  }
  0x3c   :  { %2333 = vsyncadd [#allocation5], 4294967280 }
  0x3d   :  { %2334 = dma.done.wait [#allocation3], 2048  }
  0x3e   :  { %2335 = vsyncadd [#allocation3], 4294965248 }
  0x3f   :  { %2336 = dma.done.wait [#allocation8], 2560  }
  0x40   :  { %2337 = vsyncadd [#allocation8], 4294964736 }
  0x41   :  { %69 = sfence }
  0x42   :  { %v2429_v0 = vld [vmem:[#allocation6] sm:$0xff]  ;;  %v2431_v1 = vld [vmem:[#allocation6 + $0x10] sm:$0xff]  ;;  %v2433_v2 = vld [vmem:[#allocation6 + $0x8] sm:$0xff]  ;;  %s86_s3 = sld [smem:[#allocation2]]  ;;  %s1418_s11 = sld [smem:[#allocation2 + $0x1]] }
  0x43   :  { %v87_v3 = vmul.f32 %v2429_v0, %v2429_v0  ;;  %v89_v4 = vmul.f32 %v2431_v1, %v2431_v1  ;;  %v2439_v5 = vld [vmem:[#allocation6 + $0x18] sm:$0xff]  ;;  %v88_v6 = vmul.f32 %v2433_v2, %v2433_v2  ;;  %v2445_v8 = vld [vmem:[#allocation6 + $0x28] sm:$0xff]  ;;  %v2447_v9 = vld [vmem:[#allocation6 + $0x20] sm:$0xff]  ;;  %v1891_v32 = vpack.c.bf16 %v2433_v2, %v2429_v0  ;;  %s2346_s13 = smov [#allocation10]  }
  0x44   :  { %v90_v7 = vmul.f32 %v2439_v5, %v2439_v5  ;;  %v92_v10 = vmul.f32 %v2445_v8, %v2445_v8  ;;  %v91_v11 = vmul.f32 %v2447_v9, %v2447_v9  ;;  %v2453_v12 = vld [vmem:[#allocation6 + $0x38] sm:$0xff]  ;;  %v2455_v13 = vld [vmem:[#allocation6 + $0x30] sm:$0xff]  ;;  %v2461_v16 = vld [vmem:[#allocation6 + $0x48] sm:$0xff]  ;;  %v1895_v33 = vpack.c.bf16 %v2439_v5, %v2431_v1  ;;  %s1404_s14 = sshll.u32 %s2346_s13, 4  ;;  %s1405_s14 = int_to_ptr.vmem [resolvable:$true] %s1404_s14 }
  0x45   :  { %103 = vadd.xlane.f32.xlu0 %v87_v3  ;;  %107 = vadd.xlane.f32.xlu1 %v89_v4  ;;  %v94_v14 = vmul.f32 %v2453_v12, %v2453_v12  ;;  %v93_v15 = vmul.f32 %v2455_v13, %v2455_v13  ;;  %v2463_v17 = vld [vmem:[#allocation6 + $0x40] sm:$0xff]  ;;  %v96_v18 = vmul.f32 %v2461_v16, %v2461_v16  ;;  %v2469_v20 = vld [vmem:[#allocation6 + $0x58] sm:$0xff]  ;;  %v2471_v21 = vld [vmem:[#allocation6 + $0x50] sm:$0xff]  ;;  %s2310_s2 = scalar_lea.vmem %s1405_s14, 2048  ;;  %p2315_p0 = scmp.lt.s32.totalorder %s1405_s14, %s1405_s14 }
  0x46   :  { %v95_v19 = vmul.f32 %v2463_v17, %v2463_v17  ;;  %v98_v22 = vmul.f32 %v2469_v20, %v2469_v20  ;;  %v97_v23 = vmul.f32 %v2471_v21, %v2471_v21  ;;  %v2477_v24 = vld [vmem:[#allocation6 + $0x68] sm:$0xff]  ;;  %v2479_v25 = vld [vmem:[#allocation6 + $0x60] sm:$0xff]  ;;  %v2485_v28 = vld [vmem:[#allocation6 + $0x78] sm:$0xff]  ;;  %1892 = vmatprep.subr.bf16.mxu1 %v1891_v32  ;;  %v1899_v34 = vpack.c.bf16 %v2445_v8, %v2447_v9  ;;  %p2311_p13 = scmp.ne.s32.totalorder %s1405_s14, %s2310_s2  ;;  %p2316_p1 = scmp.lt.s32.totalorder %s2310_s2, %s2310_s2 }
  0x47   :  { %v100_v26 = vmul.f32 %v2477_v24, %v2477_v24  ;;  %v99_v27 = vmul.f32 %v2479_v25, %v2479_v25  ;;  %v2487_v29 = vld [vmem:[#allocation6 + $0x70] sm:$0xff]  ;;  %v102_v30 = vmul.f32 %v2485_v28, %v2485_v28  ;;  %1894 = vmatpush3.bf16.msra.mxu1 %v1891_v32 }
  0x48   :  { %v101_v31 = vmul.f32 %v2487_v29, %v2487_v29  ;;  %1896 = vmatprep.subr.bf16.mxu1 %v1895_v33  ;;  %s345_s10 = sand.u32 2147483647, %s86_s3  ;;  %s931_s12 = sand.u32 2147483647, %s1418_s11 }
  0x49   :  { %105 = vadd.xlane.f32.xlu0 %v88_v6  ;;  %109 = vadd.xlane.f32.xlu1 %v90_v7  ;;  %p2317_p2 = por %p2316_p1, %p2315_p0 }
  0x4b   :  { %1898 = vmatpush3.bf16.msra.mxu1 %v1895_v33  ;;  %p2318_p3 = pnand %p2317_p2, %p2311_p13 }
  0x4c   :  { %1900 = vmatprep.subr.bf16.mxu1 %v1899_v34 }
  0x4d   :  { %113 = vadd.xlane.f32.xlu1 %v92_v10  ;;  %111 = vadd.xlane.f32.xlu0 %v91_v11 }
  0x4f   :  { %1902 = vmatpush3.bf16.msra.mxu1 %v1899_v34 }
  0x51   :  { %117 = vadd.xlane.f32.xlu1 %v94_v14  ;;  %115 = vadd.xlane.f32.xlu0 %v93_v15 }
  0x55   :  { %121 = vadd.xlane.f32.xlu1 %v96_v18  ;;  %119 = vadd.xlane.f32.xlu0 %v95_v19 }
  0x59   :  { %125 = vadd.xlane.f32.xlu1 %v98_v22  ;;  %123 = vadd.xlane.f32.xlu0 %v97_v23 }
  0x5d   :  { %129 = vadd.xlane.f32.xlu1 %v100_v26  ;;  %127 = vadd.xlane.f32.xlu0 %v99_v27 }
  0x61   :  { %133 = vadd.xlane.f32.xlu1 %v102_v30  ;;  %131 = vadd.xlane.f32.xlu0 %v101_v31 }
  0xd2   :  { %v104_v35 = vpop.xlane.xlu0 %103  ;;  %v108_v36 = vpop.xlane.xlu1 %107 }
  0xd3   :  { %v135_v37 = vmax.f32 %v104_v35, 1e-24  ;;  %v137_v38 = vmax.f32 %v108_v36, 1e-24 }
  0xd5   :  { %2042 = vrsqrt.f32 %v135_v37 }
  0xd6   :  { %2044 = vrsqrt.f32 %v137_v38  ;;  %v106_v39 = vpop.xlane.xlu0 %105  ;;  %v110_v40 = vpop.xlane.xlu1 %109 }
  0xd7   :  { %v136_v41 = vmax.f32 %v106_v39, 1e-24  ;;  %v138_v42 = vmax.f32 %v110_v40, 1e-24 }
  0xd9   :  { %2046 = vrsqrt.f32 %v136_v41 }
  0xda   :  { %2048 = vrsqrt.f32 %v138_v42  ;;  %v114_v43 = vpop.xlane.xlu1 %113  ;;  %v112_v44 = vpop.xlane.xlu0 %111 }
  0xdb   :  { %v140_v45 = vmax.f32 %v114_v43, 1e-24  ;;  %v139_v46 = vmax.f32 %v112_v44, 1e-24 }
  0xdd   :  { %2050 = vrsqrt.f32 %v140_v45 }
  0xde   :  { %2052 = vrsqrt.f32 %v139_v46  ;;  %v118_v47 = vpop.xlane.xlu1 %117  ;;  %v116_v48 = vpop.xlane.xlu0 %115 }
  0xdf   :  { %v2043_v49 = vpop.eup %2042  ;;  %v142_v52 = vmax.f32 %v118_v47, 1e-24  ;;  %v141_v53 = vmax.f32 %v116_v48, 1e-24 }
  0xe0   :  { %v2045_v50 = vpop.eup %2044  ;;  %v167_v51 = vmul.f32 %v2043_v49, %v2429_v0 }
  0xe1   :  { %v2501_v55 = vmul.f32 %v2045_v50, %v2431_v1  ;;  %2054 = vrsqrt.f32 %v142_v52 }
  0xe2   :  { %1611 = vmatprep.mubr.f32.mxu0 %v167_v51  ;;  %2056 = vrsqrt.f32 %v141_v53  ;;  %v122_v59 = vpop.xlane.xlu1 %121  ;;  %v120_v61 = vpop.xlane.xlu0 %119  ;;  %v1903_v53 = vpack.c.bf16 %v2453_v12, %v2455_v13 }
  0xe3   :  { %v2047_v54 = vpop.eup %2046  ;;  %v144_v1 = vmax.f32 %v122_v59, 1e-24  ;;  %v143_v3 = vmax.f32 %v120_v61, 1e-24 }
  0xe4   :  { %v2049_v56 = vpop.eup %2048  ;;  %v2504_v57 = vmul.f32 %v2047_v54, %v2433_v2  ;;  %1904 = vmatprep.subr.bf16.mxu1 %v1903_v53  ;;  %v1907_v54 = vpack.c.bf16 %v2461_v16, %v2463_v17 }
  0xe5   :  { %v2507_v58 = vmul.f32 %v2049_v56, %v2439_v5  ;;  %2058 = vrsqrt.f32 %v144_v1  ;;  %1906 = vmatpush3.bf16.msra.mxu1 %v1903_v53  ;;  %v1915_v56 = vpack.c.bf16 %v2477_v24, %v2479_v25 }
  0xe6   :  { %v1859_v60 = vpack.c.bf16 %v2504_v57, %v167_v51  ;;  %2060 = vrsqrt.f32 %v143_v3  ;;  %v126_v5 = vpop.xlane.xlu1 %125  ;;  %v124_v10 = vpop.xlane.xlu0 %123  ;;  %1908 = vmatprep.subr.bf16.mxu1 %v1907_v54 }
  0xe7   :  { %v2051_v62 = vpop.eup %2050  ;;  %v1863_v63 = vpack.c.bf16 %v2507_v58, %v2501_v55  ;;  %v146_v14 = vmax.f32 %v126_v5, 1e-24  ;;  %v145_v15 = vmax.f32 %v124_v10, 1e-24 }
  0xe8   :  { %v2053_v0 = vpop.eup %2052  ;;  %1860 = vmatprep.subr.bf16.mxu0 %v1859_v60  ;;  %v2516_v4 = vmul.f32 %v2051_v62, %v2445_v8 }
  0xe9   :  { %1862 = vmatpush3.bf16.xpose.msra.mxu0 %v1859_v60  ;;  %v2513_v2 = vmul.f32 %v2053_v0, %v2447_v9  ;;  %2062 = vrsqrt.f32 %v146_v14  ;;  %1910 = vmatpush3.bf16.msra.mxu1 %v1907_v54 }
  0xea   :  { %1864 = vmatprep.subr.bf16.mxu0 %v1863_v63  ;;  %2064 = vrsqrt.f32 %v145_v15  ;;  %v130_v8 = vpop.xlane.xlu1 %129  ;;  %v128_v23 = vpop.xlane.xlu0 %127 }
  0xeb   :  { %v2055_v6 = vpop.eup %2054  ;;  %v1867_v7 = vpack.c.bf16 %v2516_v4, %v2513_v2  ;;  %v148_v27 = vmax.f32 %v130_v8, 1e-24  ;;  %v147_v30 = vmax.f32 %v128_v23, 1e-24 }
  0xec   :  { %v2057_v11 = vpop.eup %2056  ;;  %v174_v9 = vmul.f32 %v2055_v6, %v2453_v12  ;;  %v1919_v12 = vpack.c.bf16 %v2485_v28, %v2487_v29 }
  0xed   :  { %v173_v18 = vmul.f32 %v2057_v11, %v2455_v13  ;;  %2066 = vrsqrt.f32 %v148_v27  ;;  %v2545_v13 = vstv %s86_s3  ;;  %v2565_v27 = vld [vmem:[#allocation7 + $0x8] sm:$0xff] }
  0xee   :  { %2068 = vrsqrt.f32 %v147_v30  ;;  %v134_v33 = vpop.xlane.xlu1 %133  ;;  %v132_v36 = vpop.xlane.xlu0 %131 }
  0xef   :  { %v2059_v19 = vpop.eup %2058  ;;  %v1871_v22 = vpack.c.bf16 %v174_v9, %v173_v18  ;;  %v150_v38 = vmax.f32 %v134_v33, 1e-24  ;;  %v149_v39 = vmax.f32 %v132_v36, 1e-24 }
  0xf0   :  { %v2061_v26 = vpop.eup %2060  ;;  %v176_v32 = vmul.f32 %v2059_v19, %v2461_v16 }
  0xf1   :  { %1866 = vmatpush3.bf16.xpose.msra.mxu0 %v1863_v63  ;;  %v175_v31 = vmul.f32 %v2061_v26, %v2463_v17  ;;  %2070 = vrsqrt.f32 %v150_v38  ;;  %v2547_v17 = vstv %s345_s10  ;;  %v395_v63 = vld [vmem:[#allocation7] sm:$0xff] }
  0xf2   :  { %1868 = vmatprep.subr.bf16.mxu0 %v1867_v7  ;;  %2072 = vrsqrt.f32 %v149_v39  ;;  %v399_v11 = vunpack.c.0.s8 %v395_v63  ;;  %v402_v26 = vunpack.c.3.s8 %v395_v63  ;;  %v404_v39 = vunpack.c.1.s8 %v2565_v27 }
  0xf3   :  { %v2063_v34 = vpop.eup %2062  ;;  %v1875_v35 = vpack.c.bf16 %v176_v32, %v175_v31 }
  0xf4   :  { %v2065_v37 = vpop.eup %2064  ;;  %v178_v41 = vmul.f32 %v2063_v34, %v2469_v20 }
  0xf5   :  { %v177_v40 = vmul.f32 %v2065_v37, %v2471_v21 }
  0xf7   :  { %v2067_v42 = vpop.eup %2066  ;;  %v1879_v43 = vpack.c.bf16 %v178_v41, %v177_v40 }
  0xf8   :  { %v2069_v44 = vpop.eup %2068  ;;  %v180_v46 = vmul.f32 %v2067_v42, %v2477_v24 }
  0xf9   :  { %1870 = vmatpush3.bf16.xpose.msra.mxu0 %v1867_v7  ;;  %v179_v45 = vmul.f32 %v2069_v44, %v2479_v25  ;;  %v400_v7 = vunpack.c.1.s8 %v395_v63 }
  0xfa   :  { %1872 = vmatprep.subr.bf16.mxu0 %v1871_v22 }
  0xfb   :  { %v2071_v47 = vpop.eup %2070  ;;  %v1883_v48 = vpack.c.bf16 %v180_v46, %v179_v45  ;;  %v2563_v23 = vcvt.s32.f32 %v400_v7 }
  0xfc   :  { %v2073_v49 = vpop.eup %2072  ;;  %v182_v51 = vmul.f32 %v2071_v47, %v2485_v28 }
  0xfd   :  { %v181_v50 = vmul.f32 %v2073_v49, %v2487_v29 }
  0xff   :  { %v1887_v52 = vpack.c.bf16 %v182_v51, %v181_v50 }
 0x101   :  { %1874 = vmatpush3.bf16.xpose.msra.mxu0 %v1871_v22 }
 0x102   :  { %1876 = vmatprep.subr.bf16.mxu0 %v1875_v35 }
 0x109   :  { %1878 = vmatpush3.bf16.xpose.msra.mxu0 %v1875_v35 }
 0x10a   :  { %1880 = vmatprep.subr.bf16.mxu0 %v1879_v43 }
 0x111   :  { %1882 = vmatpush3.bf16.xpose.msra.mxu0 %v1879_v43 }
 0x112   :  { %1884 = vmatprep.subr.bf16.mxu0 %v1883_v48 }
 0x119   :  { %1886 = vmatpush3.bf16.xpose.msra.mxu0 %v1883_v48 }
 0x11a   :  { %1888 = vmatprep.subr.bf16.mxu0 %v1887_v52 }
 0x121   :  { %1890 = vmatpush3.bf16.xpose.msra.mxu0 %v1887_v52 }
 0x128   :  { %1612 = vmatmul.mubr.f32.vlgmr.msra.gmra.mrb[0].mxu0 %v2504_v57 }
 0x129   :  { %1614 = vmatprep.mubr.f32.mxu0 %v2501_v55  ;;  %v1911_v55 = vpack.c.bf16 %v2469_v20, %v2471_v21 }
 0x12b   :  { %1912 = vmatprep.subr.bf16.mxu1 %v1911_v55 }
 0x12c   :  { %1615 = vmatmul.mubr.f32.gmra.mrb[2].mxu0 %v2507_v58  ;;  %1914 = vmatpush3.bf16.msra.mxu1 %v1911_v55  ;;  %v2584_v55 = vcvt.s32.f32 %v404_v39 }
 0x12d   :  { %1617 = vmatprep.mubr.f32.mxu0 %v2513_v2  ;;  %1916 = vmatprep.subr.bf16.mxu1 %v1915_v56 }
 0x130   :  { %1618 = vmatmul.mubr.f32.gmra.mrb[4].mxu0 %v2516_v4  ;;  %1918 = vmatpush3.bf16.msra.mxu1 %v1915_v56 }
 0x131   :  { %1620 = vmatprep.mubr.f32.mxu0 %v173_v18  ;;  %1920 = vmatprep.subr.bf16.mxu1 %v1919_v12 }
 0x134   :  { %1621 = vmatmul.mubr.f32.gmra.mrb[6].mxu0 %v174_v9  ;;  %1922 = vmatpush3.bf16.msra.mxu1 %v1919_v12 }
 0x135   :  { %1623 = vmatprep.mubr.f32.mxu0 %v175_v31  ;;  %v2568_v31 = vcvt.s32.f32 %v399_v11 }
 0x138   :  { %1624 = vmatmul.mubr.f32.gmra.mrb[8].mxu0 %v176_v32  ;;  %v401_v32 = vunpack.c.2.s8 %v395_v63 }
 0x139   :  { %1626 = vmatprep.mubr.f32.mxu0 %v177_v40  ;;  %v403_v40 = vunpack.c.0.s8 %v2565_v27 }
 0x13a   :  { %v2580_v48 = vcvt.s32.f32 %v401_v32 }
 0x13b   :  { %v2586_v56 = vcvt.s32.f32 %v403_v40 }
 0x13c   :  { %1627 = vmatmul.mubr.f32.gmra.mrb[10].mxu0 %v178_v41 }
 0x13d   :  { %1629 = vmatprep.mubr.f32.mxu0 %v179_v45  ;;  %v2576_v45 = vcvt.s32.f32 %v402_v26 }
 0x140   :  { %1630 = vmatmul.mubr.f32.gmra.mrb[12].mxu0 %v180_v46 }
 0x141   :  { %1632 = vmatprep.mubr.f32.mxu0 %v181_v50 }
 0x144   :  { %1633 = vmatmul.mubr.f32.gmra.mrb[14].mxu0 %v182_v51 }
 0x1fb   :  { %v1613_v16 = vpop.f32.mrb[0].mxu0 }
 0x1fc   :  { %v330_v20 = vmul.f32 %v1613_v16, %v2545_v13  ;;  %v249_v21 = vpop.f32.mrb[1].mxu0 }
 0x1fd   :  { %v329_v57 = vmul.f32 %v2545_v13, %v249_v21 }
 0x1fe   :  { %v348_v24 = vsub.f32 %v330_v20, %v2547_v17 }
 0x1ff   :  { %v347_v25 = vsub.f32 %v329_v57, %v2547_v17  ;;  %v1616_v58 = vpop.f32.mrb[2].mxu0  ;;  %v406_v57 = vunpack.c.3.s8 %v2565_v27 }
 0x200   :  { %v365_v28 = vmul.f32 1.442695, %v348_v24  ;;  %v332_v29 = vmul.f32 %v1616_v58, %v2545_v13  ;;  %v259_v59 = vpop.f32.mrb[3].mxu0  ;;  %v2591_v24 = vld [vmem:[#allocation7 + $0x10] sm:$0xff] }
 0x201   :  { %v363_v60 = vmul.f32 1.442695, %v347_v25  ;;  %v331_v61 = vmul.f32 %v2545_v13, %v259_v59 }
 0x202   :  { %2074 = vpow2.f32 %v365_v28  ;;  %v350_v62 = vsub.f32 %v332_v29, %v2547_v17  ;;  %v405_v28 = vunpack.c.2.s8 %v2565_v27 }
 0x203   :  { %2076 = vpow2.f32 %v363_v60  ;;  %v349_v0 = vsub.f32 %v331_v61, %v2547_v17  ;;  %v1619_v1 = vpop.f32.mrb[4].mxu0 }
 0x204   :  { %v369_v3 = vmul.f32 1.442695, %v350_v62  ;;  %v334_v2 = vmul.f32 %v1619_v1, %v2545_v13  ;;  %v269_v4 = vpop.f32.mrb[5].mxu0  ;;  %v407_v1 = vunpack.c.0.s8 %v2591_v24  ;;  %v2606_v11 = vcvt.s32.f32 %v405_v28 }
 0x205   :  { %v367_v5 = vmul.f32 1.442695, %v349_v0  ;;  %v333_v6 = vmul.f32 %v2545_v13, %v269_v4  ;;  %v408_v0 = vunpack.c.1.s8 %v2591_v24 }
 0x206   :  { %2078 = vpow2.f32 %v369_v3  ;;  %v352_v10 = vsub.f32 %v334_v2, %v2547_v17  ;;  %v2612_v26 = vcvt.s32.f32 %v407_v1 }
 0x207   :  { %2080 = vpow2.f32 %v367_v5  ;;  %v351_v14 = vsub.f32 %v333_v6, %v2547_v17  ;;  %v1622_v15 = vpop.f32.mrb[6].mxu0  ;;  %v2602_v6 = vcvt.s32.f32 %v406_v57 }
 0x208   :  { %v373_v18 = vmul.f32 1.442695, %v352_v10  ;;  %v336_v9 = vmul.f32 %v1622_v15, %v2545_v13  ;;  %v279_v8 = vpop.f32.mrb[7].mxu0 }
 0x209   :  { %v371_v19 = vmul.f32 1.442695, %v351_v14  ;;  %v335_v22 = vmul.f32 %v2545_v13, %v279_v8 }
 0x20a   :  { %2082 = vpow2.f32 %v373_v18  ;;  %v354_v30 = vsub.f32 %v336_v9, %v2547_v17 }
 0x20b   :  { %2084 = vpow2.f32 %v371_v19  ;;  %v353_v33 = vsub.f32 %v335_v22, %v2547_v17  ;;  %v1625_v34 = vpop.f32.mrb[8].mxu0  ;;  %v2610_v22 = vcvt.s32.f32 %v408_v0 }
 0x20c   :  { %v2075_v35 = vpop.eup %2074  ;;  %v377_v36 = vmul.f32 1.442695, %v354_v30  ;;  %v338_v37 = vmul.f32 %v1625_v34, %v2545_v13  ;;  %v289_v38 = vpop.f32.mrb[9].mxu0  ;;  %v410_v34 = vunpack.c.3.s8 %v2591_v24 }
 0x20d   :  { %v2077_v41 = vpop.eup %2076  ;;  %v375_v42 = vmul.f32 1.442695, %v353_v33  ;;  %v337_v43 = vmul.f32 %v2545_v13, %v289_v38  ;;  %v432_v44 = vmul.f32 %v2075_v35, %v2563_v23  ;;  %v398_v38 = vld [vmem:[#allocation7 + $0x18] sm:$0xff] }
 0x20e   :  { %2086 = vpow2.f32 %v377_v36  ;;  %v356_v46 = vsub.f32 %v338_v37, %v2547_v17  ;;  %v431_v47 = vmul.f32 %v2077_v41, %v2568_v31  ;;  %v409_v37 = vunpack.c.2.s8 %v2591_v24 }
 0x20f   :  { %2088 = vpow2.f32 %v375_v42  ;;  %v355_v49 = vsub.f32 %v337_v43, %v2547_v17  ;;  %449 = vadd.xlane.f32.xlu1 %v432_v44  ;;  %v1628_v50 = vpop.f32.mrb[10].mxu0 }
 0x210   :  { %v2079_v51 = vpop.eup %2078  ;;  %v381_v52 = vmul.f32 1.442695, %v356_v46  ;;  %v340_v53 = vmul.f32 %v1628_v50, %v2545_v13  ;;  %447 = vadd.xlane.f32.xlu0 %v431_v47  ;;  %v299_v54 = vpop.f32.mrb[11].mxu0  ;;  %1667 = vmatprep.mubr.f32.mxu1 %v431_v47  ;;  %v412_v46 = vunpack.c.1.s8 %v398_v38  ;;  %v411_v50 = vunpack.c.0.s8 %v398_v38 }
 0x211   :  { %v2081_v12 = vpop.eup %2080  ;;  %v379_v16 = vmul.f32 1.442695, %v355_v49  ;;  %v339_v20 = vmul.f32 %v2545_v13, %v299_v54  ;;  %1668 = vmatmul.mubr.f32.vlgmr.msra.gmra.mrb[0].mxu1 %v432_v44  ;;  %v434_v21 = vmul.f32 %v2079_v51, %v2576_v45  ;;  %v2622_v44 = vcvt.s32.f32 %v410_v34 }
 0x212   :  { %2090 = vpow2.f32 %v381_v52  ;;  %v358_v25 = vsub.f32 %v340_v53, %v2547_v17  ;;  %v433_v58 = vmul.f32 %v2081_v12, %v2580_v48  ;;  %v2625_v49 = vcvt.s32.f32 %v409_v37 }
 0x213   :  { %2092 = vpow2.f32 %v379_v16  ;;  %v357_v29 = vsub.f32 %v339_v20, %v2547_v17  ;;  %453 = vadd.xlane.f32.xlu1 %v434_v21  ;;  %v1631_v59 = vpop.f32.mrb[12].mxu0  ;;  %v2628_v53 = vcvt.s32.f32 %v412_v46  ;;  %v414_v54 = vunpack.c.3.s8 %v398_v38 }
 0x214   :  { %v2083_v60 = vpop.eup %2082  ;;  %v385_v61 = vmul.f32 1.442695, %v358_v25  ;;  %v342_v62 = vmul.f32 %v1631_v59, %v2545_v13  ;;  %451 = vadd.xlane.f32.xlu0 %v433_v58  ;;  %v309_v63 = vpop.f32.mrb[13].mxu0  ;;  %1670 = vmatprep.mubr.f32.mxu1 %v433_v58  ;;  %v2631_v16 = vcvt.s32.f32 %v411_v50  ;;  %v413_v20 = vunpack.c.2.s8 %v398_v38 }
 0x215   :  { %v2085_v3 = vpop.eup %2084  ;;  %v383_v2 = vmul.f32 1.442695, %v357_v29  ;;  %v341_v4 = vmul.f32 %v2545_v13, %v309_v63  ;;  %1671 = vmatmul.mubr.f32.gmra.mrb[2].mxu1 %v434_v21  ;;  %v436_v5 = vmul.f32 %v2083_v60, %v2584_v55  ;;  %v2634_v25 = vcvt.s32.f32 %v414_v54 }
 0x216   :  { %2094 = vpow2.f32 %v385_v61  ;;  %v360_v7 = vsub.f32 %v342_v62, %v2547_v17  ;;  %v435_v10 = vmul.f32 %v2085_v3, %v2586_v56  ;;  %v2637_v28 = vcvt.s32.f32 %v413_v20 }
 0x217   :  { %2096 = vpow2.f32 %v383_v2  ;;  %v359_v14 = vsub.f32 %v341_v4, %v2547_v17  ;;  %457 = vadd.xlane.f32.xlu1 %v436_v5  ;;  %v1634_v15 = vpop.f32.mrb[14].mxu0 }
 0x218   :  { %v2087_v18 = vpop.eup %2086  ;;  %v389_v9 = vmul.f32 1.442695, %v360_v7  ;;  %v344_v8 = vmul.f32 %v1634_v15, %v2545_v13  ;;  %455 = vadd.xlane.f32.xlu0 %v435_v10  ;;  %v319_v19 = vpop.f32.mrb[15].mxu0  ;;  %1673 = vmatprep.mubr.f32.mxu1 %v435_v10 }
 0x219   :  { %v2089_v27 = vpop.eup %2088  ;;  %v387_v30 = vmul.f32 1.442695, %v359_v14  ;;  %v343_v32 = vmul.f32 %v2545_v13, %v319_v19  ;;  %1674 = vmatmul.mubr.f32.gmra.mrb[4].mxu1 %v436_v5  ;;  %v438_v33 = vmul.f32 %v2087_v18, %v2602_v6 }
 0x21a   :  { %2098 = vpow2.f32 %v389_v9  ;;  %v362_v35 = vsub.f32 %v344_v8, %v2547_v17  ;;  %v437_v36 = vmul.f32 %v2089_v27, %v2606_v11 }
 0x21b   :  { %2100 = vpow2.f32 %v387_v30  ;;  %v361_v39 = vsub.f32 %v343_v32, %v2547_v17  ;;  %461 = vadd.xlane.f32.xlu1 %v438_v33 }
 0x21c   :  { %v2091_v40 = vpop.eup %2090  ;;  %v393_v41 = vmul.f32 1.442695, %v362_v35  ;;  %459 = vadd.xlane.f32.xlu0 %v437_v36  ;;  %1676 = vmatprep.mubr.f32.mxu1 %v437_v36 }
 0x21d   :  { %v2093_v13 = vpop.eup %2092  ;;  %v391_v42 = vmul.f32 1.442695, %v361_v39  ;;  %1677 = vmatmul.mubr.f32.gmra.mrb[6].mxu1 %v438_v33  ;;  %v440_v43 = vmul.f32 %v2091_v40, %v2610_v22 }
 0x21e   :  { %2102 = vpow2.f32 %v393_v41  ;;  %v439_v47 = vmul.f32 %v2093_v13, %v2612_v26 }
 0x21f   :  { %2104 = vpow2.f32 %v391_v42  ;;  %465 = vadd.xlane.f32.xlu1 %v440_v43 }
 0x220   :  { %v2095_v17 = vpop.eup %2094  ;;  %463 = vadd.xlane.f32.xlu0 %v439_v47  ;;  %1679 = vmatprep.mubr.f32.mxu1 %v439_v47 }
 0x221   :  { %v2097_v51 = vpop.eup %2096  ;;  %1680 = vmatmul.mubr.f32.gmra.mrb[8].mxu1 %v440_v43  ;;  %v442_v52 = vmul.f32 %v2095_v17, %v2622_v44 }
 0x222   :  { %v441_v12 = vmul.f32 %v2097_v51, %v2625_v49 }
 0x223   :  { %469 = vadd.xlane.f32.xlu1 %v442_v52 }
 0x224   :  { %v2099_v21 = vpop.eup %2098  ;;  %467 = vadd.xlane.f32.xlu0 %v441_v12  ;;  %1682 = vmatprep.mubr.f32.mxu1 %v441_v12 }
 0x225   :  { %v2101_v57 = vpop.eup %2100  ;;  %1683 = vmatmul.mubr.f32.gmra.mrb[10].mxu1 %v442_v52  ;;  %v444_v24 = vmul.f32 %v2099_v21, %v2628_v53 }
 0x226   :  { %v443_v58 = vmul.f32 %v2101_v57, %v2631_v16 }
 0x227   :  { %473 = vadd.xlane.f32.xlu1 %v444_v24 }
 0x228   :  { %v2103_v29 = vpop.eup %2102  ;;  %471 = vadd.xlane.f32.xlu0 %v443_v58  ;;  %1685 = vmatprep.mubr.f32.mxu1 %v443_v58 }
 0x229   :  { %v2105_v59 = vpop.eup %2104  ;;  %1686 = vmatmul.mubr.f32.gmra.mrb[12].mxu1 %v444_v24  ;;  %v446_v60 = vmul.f32 %v2103_v29, %v2634_v25 }
 0x22a   :  { %v445_v61 = vmul.f32 %v2105_v59, %v2637_v28 }
 0x22b   :  { %477 = vadd.xlane.f32.xlu1 %v446_v60 }
 0x22c   :  { %475 = vadd.xlane.f32.xlu0 %v445_v61  ;;  %1688 = vmatprep.mubr.f32.mxu1 %v445_v61 }
 0x22d   :  { %1689 = vmatmul.mubr.f32.gmra.mrb[14].mxu1 %v446_v60 }
 0x29c   :  { %v450_v62 = vpop.xlane.xlu1 %449 }
 0x29d   :  { %v448_v63 = vpop.xlane.xlu0 %447  ;;  %v625_v4 = vmax.f32 %v450_v62, 1e-30 }
 0x29e   :  { %v624_v5 = vmax.f32 %v448_v63, 1e-30 }
 0x29f   :  { %2106 = vrcp.f32 %v625_v4 }
 0x2a0   :  { %v454_v0 = vpop.xlane.xlu1 %453  ;;  %2108 = vrcp.f32 %v624_v5 }
 0x2a1   :  { %v452_v1 = vpop.xlane.xlu0 %451  ;;  %v627_v14 = vmax.f32 %v454_v0, 1e-30 }
 0x2a2   :  { %v626_v15 = vmax.f32 %v452_v1, 1e-30 }
 0x2a3   :  { %2110 = vrcp.f32 %v627_v14 }
 0x2a4   :  { %v458_v3 = vpop.xlane.xlu1 %457  ;;  %2112 = vrcp.f32 %v626_v15 }
 0x2a5   :  { %v456_v2 = vpop.xlane.xlu0 %455  ;;  %v629_v9 = vmax.f32 %v458_v3, 1e-30 }
 0x2a6   :  { %v628_v19 = vmax.f32 %v456_v2, 1e-30 }
 0x2a7   :  { %2114 = vrcp.f32 %v629_v9 }
 0x2a8   :  { %v462_v7 = vpop.xlane.xlu1 %461  ;;  %2116 = vrcp.f32 %v628_v19 }
 0x2a9   :  { %v460_v10 = vpop.xlane.xlu0 %459  ;;  %v631_v27 = vmax.f32 %v462_v7, 1e-30  ;;  %v2107_v33 = vpop.eup %2106 }
 0x2aa   :  { %v630_v30 = vmax.f32 %v460_v10, 1e-30  ;;  %v2109_v36 = vpop.eup %2108 }
 0x2ab   :  { %2118 = vrcp.f32 %v631_v27 }
 0x2ac   :  { %v466_v18 = vpop.xlane.xlu1 %465  ;;  %2120 = vrcp.f32 %v630_v30 }
 0x2ad   :  { %v464_v8 = vpop.xlane.xlu0 %463  ;;  %v633_v39 = vmax.f32 %v466_v18, 1e-30  ;;  %v2111_v42 = vpop.eup %2110 }
 0x2ae   :  { %v632_v41 = vmax.f32 %v464_v8, 1e-30  ;;  %v2113_v50 = vpop.eup %2112 }
 0x2af   :  { %2122 = vrcp.f32 %v633_v39 }
 0x2b0   :  { %v470_v32 = vpop.xlane.xlu1 %469  ;;  %2124 = vrcp.f32 %v632_v41 }
 0x2b1   :  { %v468_v34 = vpop.xlane.xlu0 %467  ;;  %v635_v54 = vmax.f32 %v470_v32, 1e-30  ;;  %v2115_v24 = vpop.eup %2114 }
 0x2b2   :  { %v634_v21 = vmax.f32 %v468_v34, 1e-30  ;;  %v2117_v60 = vpop.eup %2116 }
 0x2b3   :  { %2126 = vrcp.f32 %v635_v54 }
 0x2b4   :  { %v474_v17 = vpop.xlane.xlu1 %473  ;;  %2128 = vrcp.f32 %v634_v21 }
 0x2b5   :  { %v472_v12 = vpop.xlane.xlu0 %471  ;;  %v637_v63 = vmax.f32 %v474_v17, 1e-30  ;;  %v2119_v4 = vpop.eup %2118 }
 0x2b6   :  { %v636_v1 = vmax.f32 %v472_v12, 1e-30  ;;  %v2121_v15 = vpop.eup %2120 }
 0x2b7   :  { %2130 = vrcp.f32 %v637_v63 }
 0x2b8   :  { %v478_v3 = vpop.xlane.xlu1 %477  ;;  %2132 = vrcp.f32 %v636_v1 }
 0x2b9   :  { %v476_v5 = vpop.xlane.xlu0 %475  ;;  %v639_v8 = vmax.f32 %v478_v3, 1e-30  ;;  %v2123_v32 = vpop.eup %2122 }
 0x2ba   :  { %v638_v27 = vmax.f32 %v476_v5, 1e-30 }
 0x2bb   :  { %2134 = vrcp.f32 %v639_v8 }
 0x2bc   :  { %2136 = vrcp.f32 %v638_v27 }
 0x2e4   :  { %v1669_v35 = vpop.f32.mrb[0].mxu1 }
 0x2e5   :  { %v2641_v37 = vmul.f32 %v2107_v33, %v1669_v35  ;;  %v545_v38 = vpop.f32.mrb[1].mxu1 }
 0x2e6   :  { %v2643_v40 = vmul.f32 %v2109_v36, %v545_v38  ;;  %v2125_v36 = vpop.eup %2124 }
 0x2e7   :  { %v674_v13 = vmul.f32 %v2641_v37, %v2641_v37 }
 0x2e8   :  { %v1672_v43 = vpop.f32.mrb[2].mxu1  ;;  %v1955_v46 = vpack.c.bf16 %v2641_v37, %v2643_v40  ;;  %v673_v47 = vmul.f32 %v2643_v40, %v2643_v40 }
 0x2e9   :  { %v2651_v51 = vmul.f32 %v2111_v42, %v1672_v43  ;;  %v555_v52 = vpop.f32.mrb[3].mxu1  ;;  %691 = vadd.xlane.f32.xlu1 %v674_v13  ;;  %v2127_v42 = vpop.eup %2126 }
 0x2ea   :  { %v2653_v20 = vmul.f32 %v2113_v50, %v555_v52  ;;  %1956 = vmatprep.subr.bf16.mxu0 %v1955_v46  ;;  %689 = vadd.xlane.f32.xlu0 %v673_v47  ;;  %v2129_v50 = vpop.eup %2128 }
 0x2eb   :  { %1958 = vmatpush3.bf16.msra.mxu0 %v1955_v46  ;;  %v676_v57 = vmul.f32 %v2651_v51, %v2651_v51  ;;  %v2131_v21 = vpop.eup %2130 }
 0x2ec   :  { %v1675_v58 = vpop.f32.mrb[4].mxu1  ;;  %v1959_v29 = vpack.c.bf16 %v2651_v51, %v2653_v20  ;;  %v675_v59 = vmul.f32 %v2653_v20, %v2653_v20 }
 0x2ed   :  { %v2661_v61 = vmul.f32 %v2115_v24, %v1675_v58  ;;  %v565_v62 = vpop.f32.mrb[5].mxu1  ;;  %695 = vadd.xlane.f32.xlu1 %v676_v57 }
 0x2ee   :  { %v2663_v0 = vmul.f32 %v2117_v60, %v565_v62  ;;  %1960 = vmatprep.subr.bf16.mxu0 %v1959_v29  ;;  %693 = vadd.xlane.f32.xlu0 %v675_v59 }
 0x2ef   :  { %1962 = vmatpush3.bf16.msra.mxu0 %v1959_v29  ;;  %v678_v2 = vmul.f32 %v2661_v61, %v2661_v61  ;;  %v2133_v29 = vpop.eup %2132 }
 0x2f0   :  { %v1678_v7 = vpop.f32.mrb[6].mxu1  ;;  %v1963_v10 = vpack.c.bf16 %v2661_v61, %v2663_v0  ;;  %v677_v14 = vmul.f32 %v2663_v0, %v2663_v0  ;;  %v2135_v1 = vpop.eup %2134 }
 0x2f1   :  { %v2671_v18 = vmul.f32 %v2119_v4, %v1678_v7  ;;  %v575_v9 = vpop.f32.mrb[7].mxu1  ;;  %699 = vadd.xlane.f32.xlu1 %v678_v2  ;;  %v2137_v5 = vpop.eup %2136 }
 0x2f2   :  { %v2673_v19 = vmul.f32 %v2121_v15, %v575_v9  ;;  %1964 = vmatprep.subr.bf16.mxu0 %v1963_v10  ;;  %697 = vadd.xlane.f32.xlu0 %v677_v14 }
 0x2f3   :  { %1966 = vmatpush3.bf16.msra.mxu0 %v1963_v10  ;;  %v680_v30 = vmul.f32 %v2671_v18, %v2671_v18 }
 0x2f4   :  { %v1681_v33 = vpop.f32.mrb[8].mxu1  ;;  %v1967_v34 = vpack.c.bf16 %v2671_v18, %v2673_v19  ;;  %v679_v35 = vmul.f32 %v2673_v19, %v2673_v19 }
 0x2f5   :  { %v2681_v38 = vmul.f32 %v2123_v32, %v1681_v33  ;;  %v585_v39 = vpop.f32.mrb[9].mxu1  ;;  %703 = vadd.xlane.f32.xlu1 %v680_v30 }
 0x2f6   :  { %v2683_v41 = vmul.f32 %v2125_v36, %v585_v39  ;;  %1968 = vmatprep.subr.bf16.mxu0 %v1967_v34  ;;  %701 = vadd.xlane.f32.xlu0 %v679_v35 }
 0x2f7   :  { %1970 = vmatpush3.bf16.msra.mxu0 %v1967_v34  ;;  %v682_v13 = vmul.f32 %v2681_v38, %v2681_v38 }
 0x2f8   :  { %v1684_v43 = vpop.f32.mrb[10].mxu1  ;;  %v1971_v46 = vpack.c.bf16 %v2681_v38, %v2683_v41  ;;  %v681_v47 = vmul.f32 %v2683_v41, %v2683_v41 }
 0x2f9   :  { %v2691_v17 = vmul.f32 %v2127_v42, %v1684_v43  ;;  %v595_v52 = vpop.f32.mrb[11].mxu1  ;;  %707 = vadd.xlane.f32.xlu1 %v682_v13 }
 0x2fa   :  { %v2693_v54 = vmul.f32 %v2129_v50, %v595_v52  ;;  %1972 = vmatprep.subr.bf16.mxu0 %v1971_v46  ;;  %705 = vadd.xlane.f32.xlu0 %v681_v47 }
 0x2fb   :  { %1974 = vmatpush3.bf16.msra.mxu0 %v1971_v46  ;;  %v684_v12 = vmul.f32 %v2691_v17, %v2691_v17 }
 0x2fc   :  { %v1687_v57 = vpop.f32.mrb[12].mxu1  ;;  %v1975_v24 = vpack.c.bf16 %v2691_v17, %v2693_v54  ;;  %v683_v58 = vmul.f32 %v2693_v54, %v2693_v54 }
 0x2fd   :  { %v2701_v59 = vmul.f32 %v2131_v21, %v1687_v57  ;;  %v605_v60 = vpop.f32.mrb[13].mxu1  ;;  %711 = vadd.xlane.f32.xlu1 %v684_v12 }
 0x2fe   :  { %v2703_v62 = vmul.f32 %v2133_v29, %v605_v60  ;;  %1976 = vmatprep.subr.bf16.mxu0 %v1975_v24  ;;  %709 = vadd.xlane.f32.xlu0 %v683_v58 }
 0x2ff   :  { %1978 = vmatpush3.bf16.msra.mxu0 %v1975_v24  ;;  %v686_v63 = vmul.f32 %v2701_v59, %v2701_v59 }
 0x300   :  { %v1690_v3 = vpop.f32.mrb[14].mxu1  ;;  %v1979_v2 = vpack.c.bf16 %v2701_v59, %v2703_v62  ;;  %v685_v4 = vmul.f32 %v2703_v62, %v2703_v62 }
 0x301   :  { %v2711_v7 = vmul.f32 %v2135_v1, %v1690_v3  ;;  %715 = vadd.xlane.f32.xlu1 %v686_v63  ;;  %v615_v10 = vpop.f32.mrb[15].mxu1 }
 0x302   :  { %v2713_v14 = vmul.f32 %v2137_v5, %v615_v10  ;;  %1980 = vmatprep.subr.bf16.mxu0 %v1979_v2  ;;  %713 = vadd.xlane.f32.xlu0 %v685_v4 }
 0x303   :  { %1982 = vmatpush3.bf16.msra.mxu0 %v1979_v2  ;;  %v688_v15 = vmul.f32 %v2711_v7, %v2711_v7 }
 0x304   :  { %v1983_v9 = vpack.c.bf16 %v2711_v7, %v2713_v14  ;;  %v687_v8 = vmul.f32 %v2713_v14, %v2713_v14 }
 0x305   :  { %719 = vadd.xlane.f32.xlu1 %v688_v15 }
 0x306   :  { %1984 = vmatprep.subr.bf16.mxu0 %v1983_v9  ;;  %717 = vadd.xlane.f32.xlu0 %v687_v8 }
 0x307   :  { %1986 = vmatpush3.bf16.msra.mxu0 %v1983_v9 }
 0x376   :  { %v692_v27 = vpop.xlane.xlu1 %691 }
 0x377   :  { %v722_v30 = vmax.f32 %v692_v27, 1e-24  ;;  %v690_v32 = vpop.xlane.xlu0 %689 }
 0x378   :  { %v721_v33 = vmax.f32 %v690_v32, 1e-24 }
 0x379   :  { %2138 = vrsqrt.f32 %v722_v30 }
 0x37a   :  { %2140 = vrsqrt.f32 %v721_v33  ;;  %v696_v34 = vpop.xlane.xlu1 %695 }
 0x37b   :  { %v724_v35 = vmax.f32 %v696_v34, 1e-24  ;;  %v694_v36 = vpop.xlane.xlu0 %693 }
 0x37c   :  { %v723_v39 = vmax.f32 %v694_v36, 1e-24 }
 0x37d   :  { %2142 = vrsqrt.f32 %v724_v35 }
 0x37e   :  { %2144 = vrsqrt.f32 %v723_v39  ;;  %v700_v13 = vpop.xlane.xlu1 %699 }
 0x37f   :  { %v726_v42 = vmax.f32 %v700_v13, 1e-24  ;;  %v698_v43 = vpop.xlane.xlu0 %697 }
 0x380   :  { %v725_v46 = vmax.f32 %v698_v43, 1e-24 }
 0x381   :  { %2146 = vrsqrt.f32 %v726_v42 }
 0x382   :  { %2148 = vrsqrt.f32 %v725_v46  ;;  %v704_v47 = vpop.xlane.xlu1 %703 }
 0x383   :  { %v2139_v50 = vpop.eup %2138  ;;  %v728_v52 = vmax.f32 %v704_v47, 1e-24  ;;  %v702_v12 = vpop.xlane.xlu0 %701 }
 0x384   :  { %v2141_v21 = vpop.eup %2140  ;;  %v727_v57 = vmax.f32 %v702_v12, 1e-24  ;;  %v2722_v24 = vmul.f32 %v2139_v50, %v2641_v37 }
 0x385   :  { %v753_v58 = vmul.f32 %v2141_v21, %v2643_v40  ;;  %2150 = vrsqrt.f32 %v728_v52 }
 0x386   :  { %2152 = vrsqrt.f32 %v727_v57  ;;  %v708_v1 = vpop.xlane.xlu1 %707 }
 0x387   :  { %v2143_v29 = vpop.eup %2142  ;;  %1723 = vmatprep.mubr.f32.mxu1 %v753_v58  ;;  %v1923_v60 = vpack.c.bf16 %v2722_v24, %v753_v58  ;;  %v706_v2 = vpop.xlane.xlu0 %705  ;;  %v730_v5 = vmax.f32 %v708_v1, 1e-24 }
 0x388   :  { %v2145_v63 = vpop.eup %2144  ;;  %v2727_v3 = vmul.f32 %v2143_v29, %v2651_v51  ;;  %v729_v15 = vmax.f32 %v706_v2, 1e-24 }
 0x389   :  { %1924 = vmatprep.subr.bf16.mxu1 %v1923_v60  ;;  %v2730_v4 = vmul.f32 %v2145_v63, %v2653_v20  ;;  %2154 = vrsqrt.f32 %v730_v5 }
 0x38a   :  { %1926 = vmatpush3.bf16.xpose.msra.mxu1 %v1923_v60  ;;  %2156 = vrsqrt.f32 %v729_v15  ;;  %v712_v8 = vpop.xlane.xlu1 %711 }
 0x38b   :  { %v2147_v37 = vpop.eup %2146  ;;  %v1927_v40 = vpack.c.bf16 %v2727_v3, %v2730_v4  ;;  %v710_v27 = vpop.xlane.xlu0 %709  ;;  %v732_v33 = vmax.f32 %v712_v8, 1e-24 }
 0x38c   :  { %v2149_v10 = vpop.eup %2148  ;;  %v2738_v51 = vmul.f32 %v2147_v37, %v2661_v61  ;;  %v731_v34 = vmax.f32 %v710_v27, 1e-24 }
 0x38d   :  { %1928 = vmatprep.subr.bf16.mxu1 %v1927_v40  ;;  %v2735_v9 = vmul.f32 %v2149_v10, %v2663_v0  ;;  %2158 = vrsqrt.f32 %v732_v33 }
 0x38e   :  { %2160 = vrsqrt.f32 %v731_v34  ;;  %v716_v61 = vpop.xlane.xlu1 %715 }
 0x38f   :  { %v2151_v20 = vpop.eup %2150  ;;  %v1931_v30 = vpack.c.bf16 %v2738_v51, %v2735_v9  ;;  %v714_v39 = vpop.xlane.xlu0 %713  ;;  %v734_v43 = vmax.f32 %v716_v61, 1e-24 }
 0x390   :  { %v2153_v32 = vpop.eup %2152  ;;  %v760_v0 = vmul.f32 %v2151_v20, %v2671_v18  ;;  %v733_v46 = vmax.f32 %v714_v39, 1e-24 }
 0x391   :  { %v759_v35 = vmul.f32 %v2153_v32, %v2673_v19  ;;  %2162 = vrsqrt.f32 %v734_v43 }
 0x392   :  { %1930 = vmatpush3.bf16.xpose.msra.mxu1 %v1927_v40  ;;  %2164 = vrsqrt.f32 %v733_v46  ;;  %v720_v19 = vpop.xlane.xlu1 %719 }
 0x393   :  { %1932 = vmatprep.subr.bf16.mxu1 %v1931_v30  ;;  %v2155_v36 = vpop.eup %2154  ;;  %v1935_v13 = vpack.c.bf16 %v760_v0, %v759_v35  ;;  %v718_v18 = vpop.xlane.xlu0 %717  ;;  %v736_v57 = vmax.f32 %v720_v19, 1e-24 }
 0x394   :  { %v2157_v42 = vpop.eup %2156  ;;  %v762_v50 = vmul.f32 %v2155_v36, %v2681_v38  ;;  %v735_v58 = vmax.f32 %v718_v18, 1e-24 }
 0x395   :  { %v761_v47 = vmul.f32 %v2157_v42, %v2683_v41  ;;  %2166 = vrsqrt.f32 %v736_v57 }
 0x396   :  { %2168 = vrsqrt.f32 %v735_v58 }
 0x397   :  { %v2159_v52 = vpop.eup %2158  ;;  %v1939_v12 = vpack.c.bf16 %v762_v50, %v761_v47 }
 0x398   :  { %v2161_v21 = vpop.eup %2160  ;;  %v764_v60 = vmul.f32 %v2159_v52, %v2691_v17 }
 0x399   :  { %v763_v29 = vmul.f32 %v2161_v21, %v2693_v54 }
 0x39a   :  { %1934 = vmatpush3.bf16.xpose.msra.mxu1 %v1931_v30 }
 0x39b   :  { %1936 = vmatprep.subr.bf16.mxu1 %v1935_v13  ;;  %v2163_v41 = vpop.eup %2162  ;;  %v1943_v63 = vpack.c.bf16 %v764_v60, %v763_v29 }
 0x39c   :  { %v2165_v38 = vpop.eup %2164  ;;  %v766_v2 = vmul.f32 %v2163_v41, %v2701_v59  ;;  %v2757_v59 = vstv %s1418_s11 }
 0x39d   :  { %v765_v1 = vmul.f32 %v2165_v38, %v2703_v62 }
 0x39f   :  { %v2167_v37 = vpop.eup %2166  ;;  %v1947_v5 = vpack.c.bf16 %v766_v2, %v765_v1 }
 0x3a0   :  { %v2169_v40 = vpop.eup %2168  ;;  %v768_v17 = vmul.f32 %v2167_v37, %v2711_v7  ;;  %v2759_v7 = vstv %s931_s12 }
 0x3a1   :  { %v767_v54 = vmul.f32 %v2169_v40, %v2713_v14 }
 0x3a2   :  { %1938 = vmatpush3.bf16.xpose.msra.mxu1 %v1935_v13 }
 0x3a3   :  { %1940 = vmatprep.subr.bf16.mxu1 %v1939_v12  ;;  %v1951_v10 = vpack.c.bf16 %v768_v17, %v767_v54 }
 0x3aa   :  { %1942 = vmatpush3.bf16.xpose.msra.mxu1 %v1939_v12 }
 0x3ab   :  { %1944 = vmatprep.subr.bf16.mxu1 %v1943_v63 }
 0x3b2   :  { %1946 = vmatpush3.bf16.xpose.msra.mxu1 %v1943_v63 }
 0x3b3   :  { %1948 = vmatprep.subr.bf16.mxu1 %v1947_v5 }
 0x3ba   :  { %1950 = vmatpush3.bf16.xpose.msra.mxu1 %v1947_v5 }
 0x3bb   :  { %1952 = vmatprep.subr.bf16.mxu1 %v1951_v10 }
 0x3c2   :  { %1954 = vmatpush3.bf16.xpose.msra.mxu1 %v1951_v10 }
 0x3c9   :  { %1724 = vmatmul.mubr.f32.vlgmr.msra.gmra.mrb[16].mxu1 %v2722_v24 }
 0x3ca   :  { %1726 = vmatprep.mubr.f32.mxu1 %v2730_v4 }
 0x3cd   :  { %1727 = vmatmul.mubr.f32.gmra.mrb[18].mxu1 %v2727_v3 }
 0x3ce   :  { %1729 = vmatprep.mubr.f32.mxu1 %v2735_v9 }
 0x3d1   :  { %1730 = vmatmul.mubr.f32.gmra.mrb[20].mxu1 %v2738_v51 }
 0x3d2   :  { %1732 = vmatprep.mubr.f32.mxu1 %v759_v35 }
 0x3d5   :  { %1733 = vmatmul.mubr.f32.gmra.mrb[22].mxu1 %v760_v0 }
 0x3d6   :  { %1735 = vmatprep.mubr.f32.mxu1 %v761_v47 }
 0x3d9   :  { %1736 = vmatmul.mubr.f32.gmra.mrb[24].mxu1 %v762_v50 }
 0x3da   :  { %1738 = vmatprep.mubr.f32.mxu1 %v763_v29 }
 0x3dd   :  { %1739 = vmatmul.mubr.f32.gmra.mrb[26].mxu1 %v764_v60 }
 0x3de   :  { %1741 = vmatprep.mubr.f32.mxu1 %v765_v1 }
 0x3e1   :  { %1742 = vmatmul.mubr.f32.gmra.mrb[28].mxu1 %v766_v2 }
 0x3e2   :  { %1744 = vmatprep.mubr.f32.mxu1 %v767_v54 }
 0x3e5   :  { %1745 = vmatmul.mubr.f32.gmra.mrb[30].mxu1 %v768_v17 }
 0x49c   :  { %v1725_v62 = vpop.f32.mrb[16].mxu1 }
 0x49d   :  { %v916_v14 = vmul.f32 %v1725_v62, %v2757_v59  ;;  %v835_v24 = vpop.f32.mrb[17].mxu1 }
 0x49e   :  { %v915_v3 = vmul.f32 %v2757_v59, %v835_v24 }
 0x49f   :  { %v934_v4 = vsub.f32 %v916_v14, %v2759_v7 }
 0x4a0   :  { %v933_v15 = vsub.f32 %v915_v3, %v2759_v7  ;;  %v1728_v9 = vpop.f32.mrb[18].mxu1 }
 0x4a1   :  { %v951_v51 = vmul.f32 1.442695, %v934_v4  ;;  %v918_v8 = vmul.f32 %v1728_v9, %v2757_v59  ;;  %v845_v20 = vpop.f32.mrb[19].mxu1 }
 0x4a2   :  { %v949_v27 = vmul.f32 1.442695, %v933_v15  ;;  %v917_v30 = vmul.f32 %v2757_v59, %v845_v20 }
 0x4a3   :  { %2170 = vpow2.f32 %v951_v51  ;;  %v936_v32 = vsub.f32 %v918_v8, %v2759_v7 }
 0x4a4   :  { %2172 = vpow2.f32 %v949_v27  ;;  %v935_v33 = vsub.f32 %v917_v30, %v2759_v7  ;;  %v1731_v34 = vpop.f32.mrb[20].mxu1 }
 0x4a5   :  { %v955_v35 = vmul.f32 1.442695, %v936_v32  ;;  %v920_v0 = vmul.f32 %v1731_v34, %v2757_v59  ;;  %v855_v61 = vpop.f32.mrb[21].mxu1 }
 0x4a6   :  { %v953_v36 = vmul.f32 1.442695, %v935_v33  ;;  %v919_v39 = vmul.f32 %v2757_v59, %v855_v61 }
 0x4a7   :  { %2174 = vpow2.f32 %v955_v35  ;;  %v938_v13 = vsub.f32 %v920_v0, %v2759_v7 }
 0x4a8   :  { %2176 = vpow2.f32 %v953_v36  ;;  %v937_v42 = vsub.f32 %v919_v39, %v2759_v7  ;;  %v1734_v43 = vpop.f32.mrb[22].mxu1 }
 0x4a9   :  { %v959_v46 = vmul.f32 1.442695, %v938_v13  ;;  %v922_v47 = vmul.f32 %v1734_v43, %v2757_v59  ;;  %v865_v50 = vpop.f32.mrb[23].mxu1 }
 0x4aa   :  { %v957_v19 = vmul.f32 1.442695, %v937_v42  ;;  %v921_v52 = vmul.f32 %v2757_v59, %v865_v50 }
 0x4ab   :  { %2178 = vpow2.f32 %v959_v46  ;;  %v940_v18 = vsub.f32 %v922_v47, %v2759_v7 }
 0x4ac   :  { %2180 = vpow2.f32 %v957_v19  ;;  %v939_v12 = vsub.f32 %v921_v52, %v2759_v7  ;;  %v1737_v21 = vpop.f32.mrb[24].mxu1 }
 0x4ad   :  { %v2171_v57 = vpop.eup %2170  ;;  %v963_v58 = vmul.f32 1.442695, %v940_v18  ;;  %v924_v29 = vmul.f32 %v1737_v21, %v2757_v59  ;;  %v875_v60 = vpop.f32.mrb[25].mxu1 }
 0x4ae   :  { %v2173_v41 = vpop.eup %2172  ;;  %v961_v63 = vmul.f32 1.442695, %v939_v12  ;;  %v923_v38 = vmul.f32 %v2757_v59, %v875_v60  ;;  %v982_v1 = vmul.f32 %v2171_v57, %v2563_v23 }
 0x4af   :  { %2182 = vpow2.f32 %v963_v58  ;;  %v942_v2 = vsub.f32 %v924_v29, %v2759_v7  ;;  %v981_v37 = vmul.f32 %v2173_v41, %v2568_v31 }
 0x4b0   :  { %2184 = vpow2.f32 %v961_v63  ;;  %v941_v5 = vsub.f32 %v923_v38, %v2759_v7  ;;  %999 = vadd.xlane.f32.xlu0 %v982_v1  ;;  %v1740_v40 = vpop.f32.mrb[26].mxu1  ;;  %v1223_v63 = vld [vmem:[#allocation9 + $0x8] sm:$0xff] }
 0x4b1   :  { %v2175_v54 = vpop.eup %2174  ;;  %v967_v17 = vmul.f32 1.442695, %v942_v2  ;;  %v926_v10 = vmul.f32 %v1740_v40, %v2757_v59  ;;  %v885_v62 = vpop.f32.mrb[27].mxu1  ;;  %1779 = vmatprep.mubr.f32.mxu0 %v981_v37  ;;  %v1226_v2 = vld [vmem:[#allocation9 + $0x20] sm:$0xff]  ;;  %v1229_v40 = vld [vmem:[#allocation9 + $0x38] sm:$0xff] }
 0x4b2   :  { %v2177_v14 = vpop.eup %2176  ;;  %v965_v24 = vmul.f32 1.442695, %v941_v5  ;;  %v925_v23 = vmul.f32 %v2757_v59, %v885_v62  ;;  %1780 = vmatmul.mubr.f32.vlgmr.msra.gmra.mrb[16].mxu0 %v982_v1  ;;  %v984_v9 = vmul.f32 %v2175_v54, %v2576_v45  ;;  %v1225_v1 = vld [vmem:[#allocation9 + $0x18] sm:$0xff] }
 0x4b3   :  { %2186 = vpow2.f32 %v967_v17  ;;  %v944_v3 = vsub.f32 %v926_v10, %v2759_v7  ;;  %v983_v31 = vmul.f32 %v2177_v14, %v2580_v48  ;;  %v1230_v17 = vld [vmem:[#allocation9 + $0x40] sm:$0xff]  ;;  %v1231_v10 = vld [vmem:[#allocation9 + $0x48] sm:$0xff]  ;;  %v1232_v14 = vld [vmem:[#allocation9 + $0x50] sm:$0xff] }
 0x4b4   :  { %2188 = vpow2.f32 %v965_v24  ;;  %v943_v4 = vsub.f32 %v925_v23, %v2759_v7  ;;  %997 = vadd.xlane.f32.xlu0 %v981_v37  ;;  %v1743_v15 = vpop.f32.mrb[28].mxu1  ;;  %v1227_v37 = vld [vmem:[#allocation9 + $0x28] sm:$0xff]  ;;  %v2003_v62 = vpack.c.bf16 %v1231_v10, %v1230_v17  ;;  %v1233_v24 = vld [vmem:[#allocation9 + $0x58] sm:$0xff] }
 0x4b5   :  { %v2179_v51 = vpop.eup %2178  ;;  %v971_v8 = vmul.f32 1.442695, %v944_v3  ;;  %v928_v20 = vmul.f32 %v1743_v15, %v2757_v59  ;;  %v895_v27 = vpop.f32.mrb[29].mxu1  ;;  %1782 = vmatprep.mubr.f32.mxu0 %v983_v31  ;;  %v1995_v5 = vpack.c.bf16 %v1227_v37, %v1226_v2  ;;  %v2007_v23 = vpack.c.bf16 %v1233_v24, %v1232_v14  ;;  %v1234_v3 = vld [vmem:[#allocation9 + $0x60] sm:$0xff]  ;;  %v1236_v15 = vld [vmem:[#allocation9 + $0x70] sm:$0xff] }
 0x4b6   :  { %v2181_v30 = vpop.eup %2180  ;;  %v969_v32 = vmul.f32 1.442695, %v943_v4  ;;  %v927_v33 = vmul.f32 %v2757_v59, %v895_v27  ;;  %1783 = vmatmul.mubr.f32.gmra.mrb[18].mxu0 %v984_v9  ;;  %v986_v0 = vmul.f32 %v2179_v51, %v2584_v55 }
 0x4b7   :  { %2190 = vpow2.f32 %v971_v8  ;;  %v946_v48 = vsub.f32 %v928_v20, %v2759_v7  ;;  %v985_v34 = vmul.f32 %v2181_v30, %v2586_v56 }
 0x4b8   :  { %2192 = vpow2.f32 %v969_v32  ;;  %v945_v35 = vsub.f32 %v927_v33, %v2759_v7  ;;  %1003 = vadd.xlane.f32.xlu0 %v984_v9  ;;  %v1746_v45 = vpop.f32.mrb[30].mxu1  ;;  %v1237_v9 = vld [vmem:[#allocation9 + $0x78] sm:$0xff] }
 0x4b9   :  { %v2183_v61 = vpop.eup %2182  ;;  %v975_v36 = vmul.f32 1.442695, %v946_v48  ;;  %v930_v39 = vmul.f32 %v1746_v45, %v2757_v59  ;;  %v905_v13 = vpop.f32.mrb[31].mxu1  ;;  %1785 = vmatprep.mubr.f32.mxu0 %v985_v34  ;;  %v2015_v51 = vpack.c.bf16 %v1237_v9, %v1236_v15 }
 0x4ba   :  { %v2185_v42 = vpop.eup %2184  ;;  %v973_v43 = vmul.f32 1.442695, %v945_v35  ;;  %v929_v46 = vmul.f32 %v2757_v59, %v905_v13  ;;  %1786 = vmatmul.mubr.f32.gmra.mrb[20].mxu0 %v986_v0  ;;  %v988_v55 = vmul.f32 %v2183_v61, %v2602_v6 }
 0x4bb   :  { %2194 = vpow2.f32 %v975_v36  ;;  %v948_v56 = vsub.f32 %v930_v39, %v2759_v7  ;;  %v987_v47 = vmul.f32 %v2185_v42, %v2606_v11 }
 0x4bc   :  { %2196 = vpow2.f32 %v973_v43  ;;  %v947_v50 = vsub.f32 %v929_v46, %v2759_v7  ;;  %1001 = vadd.xlane.f32.xlu0 %v983_v31  ;;  %v1235_v31 = vld [vmem:[#allocation9 + $0x68] sm:$0xff] }
 0x4bd   :  { %v2187_v19 = vpop.eup %2186  ;;  %v979_v52 = vmul.f32 1.442695, %v948_v56  ;;  %1788 = vmatprep.mubr.f32.mxu0 %v987_v47  ;;  %v2011_v4 = vpack.c.bf16 %v1235_v31, %v1234_v3 }
 0x4be   :  { %v2189_v18 = vpop.eup %2188  ;;  %v977_v12 = vmul.f32 1.442695, %v947_v50  ;;  %1789 = vmatmul.mubr.f32.gmra.mrb[22].mxu0 %v988_v55  ;;  %v990_v59 = vmul.f32 %v2187_v19, %v2610_v22 }
 0x4bf   :  { %2198 = vpow2.f32 %v979_v52  ;;  %v989_v21 = vmul.f32 %v2189_v18, %v2612_v26 }
 0x4c0   :  { %2200 = vpow2.f32 %v977_v12  ;;  %1007 = vadd.xlane.f32.xlu0 %v986_v0  ;;  %1015 = vadd.xlane.f32.xlu1 %v990_v59 }
 0x4c1   :  { %v2191_v11 = vpop.eup %2190  ;;  %1791 = vmatprep.mubr.f32.mxu0 %v989_v21 }
 0x4c2   :  { %v2193_v7 = vpop.eup %2192  ;;  %1792 = vmatmul.mubr.f32.gmra.mrb[24].mxu0 %v990_v59  ;;  %v992_v57 = vmul.f32 %v2191_v11, %v2622_v44 }
 0x4c3   :  { %v991_v6 = vmul.f32 %v2193_v7, %v2625_v49 }
 0x4c4   :  { %1005 = vadd.xlane.f32.xlu0 %v985_v34  ;;  %1013 = vadd.xlane.f32.xlu1 %v989_v21 }
 0x4c5   :  { %v2195_v58 = vpop.eup %2194  ;;  %1794 = vmatprep.mubr.f32.mxu0 %v991_v6 }
 0x4c6   :  { %v2197_v29 = vpop.eup %2196  ;;  %1795 = vmatmul.mubr.f32.gmra.mrb[26].mxu0 %v992_v57  ;;  %v994_v26 = vmul.f32 %v2195_v58, %v2628_v53  ;;  %v1224_v53 = vld [vmem:[#allocation9 + $0x10] sm:$0xff] }
 0x4c7   :  { %v993_v22 = vmul.f32 %v2197_v29, %v2631_v16  ;;  %v1222_v16 = vld [vmem:[#allocation9] sm:$0xff] }
 0x4c8   :  { %1009 = vadd.xlane.f32.xlu0 %v987_v47  ;;  %1019 = vadd.xlane.f32.xlu1 %v992_v57  ;;  %v1987_v38 = vpack.c.bf16 %v1223_v63, %v1222_v16 }
 0x4c9   :  { %v2199_v60 = vpop.eup %2198  ;;  %1797 = vmatprep.mubr.f32.mxu0 %v993_v22 }
 0x4ca   :  { %v2201_v41 = vpop.eup %2200  ;;  %1798 = vmatmul.mubr.f32.gmra.mrb[28].mxu0 %v994_v26  ;;  %v996_v44 = vmul.f32 %v2199_v60, %v2634_v25  ;;  %1988 = vmatprep.subr.bf16.mxu0 %v1987_v38  ;;  %v1228_v25 = vld [vmem:[#allocation9 + $0x30] sm:$0xff] }
 0x4cb   :  { %v995_v49 = vmul.f32 %v2201_v41, %v2637_v28  ;;  %2019 = vmatprep.subr.bf16.mxu1 %v1987_v38  ;;  %1990 = vmatpush3.bf16.msra.mxu0 %v1987_v38  ;;  %v1991_v28 = vpack.c.bf16 %v1225_v1, %v1224_v53  ;;  %v1999_v54 = vpack.c.bf16 %v1229_v40, %v1228_v25 }
 0x4cc   :  { %1011 = vadd.xlane.f32.xlu0 %v988_v55  ;;  %1017 = vadd.xlane.f32.xlu1 %v991_v6 }
 0x4cd   :  { %1800 = vmatprep.mubr.f32.mxu0 %v995_v49  ;;  %2027 = vmatpush3.bf16.msra.mxu1 %v1987_v38 }
 0x4ce   :  { %1801 = vmatmul.mubr.f32.gmra.mrb[30].mxu0 %v996_v44  ;;  %1992 = vmatprep.subr.bf16.mxu0 %v1991_v28 }
 0x4cf   :  { %2020 = vmatprep.subr.bf16.mxu1 %v1991_v28  ;;  %1994 = vmatpush3.bf16.msra.mxu0 %v1991_v28 }
 0x4d0   :  { %1023 = vadd.xlane.f32.xlu1 %v994_v26  ;;  %1996 = vmatprep.subr.bf16.mxu0 %v1995_v5 }
 0x4d1   :  { %2028 = vmatpush3.bf16.msra.mxu1 %v1991_v28 }
 0x4d2   :  { %2021 = vmatprep.subr.bf16.mxu1 %v1995_v5 }
 0x4d3   :  { %1998 = vmatpush3.bf16.msra.mxu0 %v1995_v5 }
 0x4d4   :  { %1021 = vadd.xlane.f32.xlu1 %v993_v22  ;;  %2000 = vmatprep.subr.bf16.mxu0 %v1999_v54 }
 0x4d5   :  { %2029 = vmatpush3.bf16.msra.mxu1 %v1995_v5 }
 0x4d6   :  { %2022 = vmatprep.subr.bf16.mxu1 %v1999_v54 }
 0x4d7   :  { %2002 = vmatpush3.bf16.msra.mxu0 %v1999_v54 }
 0x4d8   :  { %1025 = vadd.xlane.f32.xlu1 %v995_v49  ;;  %2004 = vmatprep.subr.bf16.mxu0 %v2003_v62 }
 0x4d9   :  { %2030 = vmatpush3.bf16.msra.mxu1 %v1999_v54 }
 0x4da   :  { %2023 = vmatprep.subr.bf16.mxu1 %v2003_v62 }
 0x4db   :  { %2006 = vmatpush3.bf16.msra.mxu0 %v2003_v62 }
 0x4dc   :  { %1027 = vadd.xlane.f32.xlu1 %v996_v44  ;;  %2008 = vmatprep.subr.bf16.mxu0 %v2007_v23 }
 0x4dd   :  { %2031 = vmatpush3.bf16.msra.mxu1 %v2003_v62 }
 0x4de   :  { %2024 = vmatprep.subr.bf16.mxu1 %v2007_v23 }
 0x4df   :  { %2010 = vmatpush3.bf16.msra.mxu0 %v2007_v23 }
 0x4e0   :  { %2012 = vmatprep.subr.bf16.mxu0 %v2011_v4 }
 0x4e1   :  { %2032 = vmatpush3.bf16.msra.mxu1 %v2007_v23 }
 0x4e2   :  { %2025 = vmatprep.subr.bf16.mxu1 %v2011_v4 }
 0x4e3   :  { %2014 = vmatpush3.bf16.msra.mxu0 %v2011_v4 }
 0x4e4   :  { %2016 = vmatprep.subr.bf16.mxu0 %v2015_v51 }
 0x4e5   :  { %2033 = vmatpush3.bf16.msra.mxu1 %v2011_v4 }
 0x4e6   :  { %2026 = vmatprep.subr.bf16.mxu1 %v2015_v51 }
 0x4e7   :  { %2018 = vmatpush3.bf16.msra.mxu0 %v2015_v51 }
 0x4e9   :  { %2034 = vmatpush3.bf16.msra.mxu1 %v2015_v51 }
 0x53d   :  { %v1000_v8 = vpop.xlane.xlu0 %999 }
 0x53e   :  { %v1175_v0 = vmax.f32 %v1000_v8, 1e-30 }
 0x541   :  { %v998_v20 = vpop.xlane.xlu0 %997 }
 0x542   :  { %v1174_v45 = vmax.f32 %v998_v20, 1e-30 }
 0x544   :  { %2202 = vrcp.f32 %v1174_v45 }
 0x545   :  { %v1004_v27 = vpop.xlane.xlu0 %1003  ;;  %2204 = vrcp.f32 %v1175_v0 }
 0x546   :  { %v1177_v13 = vmax.f32 %v1004_v27, 1e-30 }
 0x549   :  { %v1002_v32 = vpop.xlane.xlu0 %1001 }
 0x54a   :  { %v1176_v36 = vmax.f32 %v1002_v32, 1e-30 }
 0x54c   :  { %2206 = vrcp.f32 %v1176_v36 }
 0x54d   :  { %v1016_v30 = vpop.xlane.xlu1 %1015  ;;  %v1008_v48 = vpop.xlane.xlu0 %1007  ;;  %2208 = vrcp.f32 %v1177_v13 }
 0x54e   :  { %v1179_v46 = vmax.f32 %v1008_v48, 1e-30  ;;  %v2203_v19 = vpop.eup %2202  ;;  %v1183_v7 = vmax.f32 %v1016_v30, 1e-30 }
 0x54f   :  { %v2205_v12 = vpop.eup %2204 }
 0x551   :  { %v1014_v33 = vpop.xlane.xlu1 %1013  ;;  %v1006_v35 = vpop.xlane.xlu0 %1005 }
 0x552   :  { %v1178_v42 = vmax.f32 %v1006_v35, 1e-30  ;;  %v1182_v21 = vmax.f32 %v1014_v33, 1e-30 }
 0x554   :  { %2210 = vrcp.f32 %v1178_v42 }
 0x555   :  { %v1020_v34 = vpop.xlane.xlu1 %1019  ;;  %v1010_v39 = vpop.xlane.xlu0 %1009  ;;  %2212 = vrcp.f32 %v1179_v46 }
 0x556   :  { %v1180_v47 = vmax.f32 %v1010_v39, 1e-30  ;;  %v2207_v57 = vpop.eup %2206  ;;  %v1185_v49 = vmax.f32 %v1020_v34, 1e-30 }
 0x557   :  { %v2209_v29 = vpop.eup %2208 }
 0x558   :  { %2214 = vrcp.f32 %v1180_v47 }
 0x559   :  { %v1018_v61 = vpop.xlane.xlu1 %1017  ;;  %v1012_v56 = vpop.xlane.xlu0 %1011 }
 0x55a   :  { %v1181_v50 = vmax.f32 %v1012_v56, 1e-30  ;;  %v1184_v26 = vmax.f32 %v1018_v61, 1e-30 }
 0x55c   :  { %2216 = vrcp.f32 %v1181_v50 }
 0x55d   :  { %v1024_v43 = vpop.xlane.xlu1 %1023  ;;  %2218 = vrcp.f32 %v1182_v21 }
 0x55e   :  { %2220 = vrcp.f32 %v1183_v7  ;;  %v2211_v16 = vpop.eup %2210  ;;  %v1187_v28 = vmax.f32 %v1024_v43, 1e-30 }
 0x55f   :  { %v2213_v38 = vpop.eup %2212  ;;  %2222 = vrcp.f32 %v1184_v26 }
 0x560   :  { %2224 = vrcp.f32 %v1185_v49 }
 0x561   :  { %v1022_v52 = vpop.xlane.xlu1 %1021 }
 0x562   :  { %v1186_v1 = vmax.f32 %v1022_v52, 1e-30  ;;  %v2215_v5 = vpop.eup %2214 }
 0x564   :  { %2226 = vrcp.f32 %v1186_v1 }
 0x565   :  { %v1026_v60 = vpop.xlane.xlu1 %1025  ;;  %2228 = vrcp.f32 %v1187_v28 }
 0x566   :  { %v2217_v54 = vpop.eup %2216  ;;  %v1188_v10 = vmax.f32 %v1026_v60, 1e-30 }
 0x567   :  { %v2219_v23 = vpop.eup %2218 }
 0x568   :  { %v2221_v31 = vpop.eup %2220  ;;  %2230 = vrcp.f32 %v1188_v10 }
 0x569   :  { %v1028_v25 = vpop.xlane.xlu1 %1027  ;;  %v2223_v51 = vpop.eup %2222 }
 0x56a   :  { %v1189_v14 = vmax.f32 %v1028_v25, 1e-30  ;;  %v2225_v20 = vpop.eup %2224 }
 0x56c   :  { %2232 = vrcp.f32 %v1189_v14 }
 0x56e   :  { %v2227_v33 = vpop.eup %2226 }
 0x56f   :  { %v2229_v34 = vpop.eup %2228 }
 0x572   :  { %v2231_v61 = vpop.eup %2230 }
 0x576   :  { %v2233_v39 = vpop.eup %2232 }
 0x585   :  { %v1781_v55 = vpop.f32.mrb[16].mxu0 }
 0x586   :  { %v1095_v18 = vpop.f32.mrb[17].mxu0  ;;  %v1207_v11 = vmul.f32 %v2205_v12, %v1781_v55 }
 0x587   :  { %v1206_v59 = vmul.f32 %v2203_v19, %v1095_v18 }
 0x589   :  { %v1784_v6 = vpop.f32.mrb[18].mxu0  ;;  %1835 = vmatprep.mubr.f32.mxu0 %v1206_v59 }
 0x58a   :  { %v1105_v58 = vpop.f32.mrb[19].mxu0  ;;  %1836 = vmatmul.mubr.f32.vlgmr.msra.gmra.mrb[32].mxu0 %v1207_v11  ;;  %v1209_v41 = vmul.f32 %v2209_v29, %v1784_v6 }
 0x58b   :  { %v1208_v22 = vmul.f32 %v2207_v57, %v1105_v58 }
 0x58d   :  { %v1787_v44 = vpop.f32.mrb[20].mxu0  ;;  %1838 = vmatprep.mubr.f32.mxu0 %v1208_v22 }
 0x58e   :  { %v1115_v63 = vpop.f32.mrb[21].mxu0  ;;  %1839 = vmatmul.mubr.f32.gmra.mrb[34].mxu0 %v1209_v41  ;;  %v1211_v2 = vmul.f32 %v2213_v38, %v1787_v44 }
 0x58f   :  { %v1210_v53 = vmul.f32 %v2211_v16, %v1115_v63 }
 0x591   :  { %v1790_v37 = vpop.f32.mrb[22].mxu0  ;;  %1841 = vmatprep.mubr.f32.mxu0 %v1210_v53 }
 0x592   :  { %v1125_v40 = vpop.f32.mrb[23].mxu0  ;;  %1842 = vmatmul.mubr.f32.gmra.mrb[36].mxu0 %v1211_v2  ;;  %v1213_v62 = vmul.f32 %v2217_v54, %v1790_v37 }
 0x593   :  { %v1212_v17 = vmul.f32 %v2215_v5, %v1125_v40 }
 0x595   :  { %v1793_v24 = vpop.f32.mrb[24].mxu0  ;;  %1844 = vmatprep.mubr.f32.mxu0 %v1212_v17 }
 0x596   :  { %v1135_v3 = vpop.f32.mrb[25].mxu0  ;;  %1845 = vmatmul.mubr.f32.gmra.mrb[38].mxu0 %v1213_v62  ;;  %v1215_v15 = vmul.f32 %v2221_v31, %v1793_v24 }
 0x597   :  { %v1214_v4 = vmul.f32 %v2219_v23, %v1135_v3 }
 0x599   :  { %v1796_v9 = vpop.f32.mrb[26].mxu0  ;;  %1847 = vmatprep.mubr.f32.mxu1 %v1214_v4 }
 0x59a   :  { %v1145_v8 = vpop.f32.mrb[27].mxu0  ;;  %1848 = vmatmul.mubr.f32.vlgmr.msra.gmra.mrb[32].mxu1 %v1215_v15  ;;  %v1217_v30 = vmul.f32 %v2225_v20, %v1796_v9 }
 0x59b   :  { %v1216_v27 = vmul.f32 %v2223_v51, %v1145_v8 }
 0x59d   :  { %v1799_v32 = vpop.f32.mrb[28].mxu0  ;;  %1850 = vmatprep.mubr.f32.mxu1 %v1216_v27 }
 0x59e   :  { %v1155_v48 = vpop.f32.mrb[29].mxu0  ;;  %1851 = vmatmul.mubr.f32.gmra.mrb[34].mxu1 %v1217_v30  ;;  %v1219_v45 = vmul.f32 %v2229_v34, %v1799_v32 }
 0x59f   :  { %v1218_v35 = vmul.f32 %v2227_v33, %v1155_v48 }
 0x5a1   :  { %v1802_v0 = vpop.f32.mrb[30].mxu0  ;;  %1853 = vmatprep.mubr.f32.mxu1 %v1218_v35 }
 0x5a2   :  { %v1165_v36 = vpop.f32.mrb[31].mxu0  ;;  %1854 = vmatmul.mubr.f32.gmra.mrb[36].mxu1 %v1219_v45  ;;  %v1221_v42 = vmul.f32 %v2233_v39, %v1802_v0 }
 0x5a3   :  { %v1220_v13 = vmul.f32 %v2231_v61, %v1165_v36 }
 0x5a5   :  { %1856 = vmatprep.mubr.f32.mxu1 %v1220_v13 }
 0x5a6   :  { %1857 = vmatmul.mubr.f32.gmra.mrb[38].mxu1 %v1221_v42 }
 0x65d   :  { %v1837_v43 = vpop.f32.mrb[32].mxu0 }
 0x65e   :  { %1384 = vst [vmem:[#allocation10 + $0x8] sm:$0xff] %v1837_v43  ;;  %v1304_v46 = vpop.f32.mrb[33].mxu0 }
 0x65f   :  { %1383 = vst [vmem:[#allocation10] sm:$0xff] %v1304_v46 }
 0x661   :  { %v1840_v56 = vpop.f32.mrb[34].mxu0 }
 0x662   :  { %1386 = vst [vmem:[#allocation10 + $0x18] sm:$0xff] %v1840_v56  ;;  %v1314_v47 = vpop.f32.mrb[35].mxu0 }
 0x663   :  { %1385 = vst [vmem:[#allocation10 + $0x10] sm:$0xff] %v1314_v47 }
 0x665   :  { %v1843_v50 = vpop.f32.mrb[36].mxu0 }
 0x666   :  { %1388 = vst [vmem:[#allocation10 + $0x28] sm:$0xff] %v1843_v50  ;;  %v1324_v55 = vpop.f32.mrb[37].mxu0 }
 0x667   :  { %1387 = vst [vmem:[#allocation10 + $0x20] sm:$0xff] %v1324_v55 }
 0x669   :  { %v1846_v19 = vpop.f32.mrb[38].mxu0 }
 0x66a   :  { %1390 = vst [vmem:[#allocation10 + $0x38] sm:$0xff] %v1846_v19  ;;  %v1334_v52 = vpop.f32.mrb[39].mxu0 }
 0x66b   :  { %1389 = vst [vmem:[#allocation10 + $0x30] sm:$0xff] %v1334_v52 }
 0x66d   :  { %v1849_v18 = vpop.f32.mrb[32].mxu1 }
 0x66e   :  { %1392 = vst [vmem:[#allocation10 + $0x48] sm:$0xff] %v1849_v18  ;;  %v1344_v12 = vpop.f32.mrb[33].mxu1 }
 0x66f   :  { %1391 = vst [vmem:[#allocation10 + $0x40] sm:$0xff] %v1344_v12 }
 0x671   :  { %v1852_v59 = vpop.f32.mrb[34].mxu1 }
 0x672   :  { %1394 = vst [vmem:[#allocation10 + $0x58] sm:$0xff] %v1852_v59  ;;  %v1354_v21 = vpop.f32.mrb[35].mxu1 }
 0x673   :  { %1393 = vst [vmem:[#allocation10 + $0x50] sm:$0xff] %v1354_v21 }
 0x675   :  { %v1855_v11 = vpop.f32.mrb[36].mxu1 }
 0x676   :  { %1396 = vst [vmem:[#allocation10 + $0x68] sm:$0xff] %v1855_v11  ;;  %v1364_v7 = vpop.f32.mrb[37].mxu1 }
 0x677   :  { %1395 = vst [vmem:[#allocation10 + $0x60] sm:$0xff] %v1364_v7 }
 0x679   :  { %v1858_v6 = vpop.f32.mrb[38].mxu1 }
 0x67a   :  { %1398 = vst [vmem:[#allocation10 + $0x78] sm:$0xff] %v1858_v6  ;;  %v1374_v57 = vpop.f32.mrb[39].mxu1 }
 0x67b   :  { %1397 = vst [vmem:[#allocation10 + $0x70] sm:$0xff] %v1374_v57 }
 0x67c   :  { %2321 = shalt.err (!%p2318_p3)
}
 0x67d   :  { %s2322_s17 = scalar_lea.hbm %s2828_s4, 2048 }
 0x67e   :  { %p2323_p4 = scmp.ne.s32.totalorder %s2828_s4, %s2322_s17  ;;  %p2326_p5 = scmp.lt.u32.totalorder %s2322_s17, %s2828_s4 }
 0x680   :  { %p2328_p6 = pnand %p2326_p5, %p2323_p4 }
 0x682   :  { %2331 = shalt.err (!%p2328_p6)
}
 0x683   :  { %1410 = dma.vmem_to_hbm [thread:$0]  %s1405_s14, 2048, %s2828_s4, [#allocation4], %s2342_s27, %s2342_s27, %s2343_s28  }
 0x684   :  { %2338 = dma.done.wait [#allocation4], 2048  }
 0x685   :  { %2339 = vsyncadd [#allocation4], 4294965248 }
 0x686   :  { %1414 = vsyncpa [#allocation3], 1 }
 0x687   :  { %1415 = vsyncpa [#allocation8], 1 }
 0x688   :  { %1416 = vsyncpa [#allocation4], 1 }
 0x689   :  { %1417 = vsyncpa [#allocation5], 1 }

</bundles_post_ra>
